<compile_context>
chip_gen: v7x
topology: tpu7x:2x2x1
jax: 0.10.0
libtpu: 0.0.40
codegen_flags: <defaults>
</compile_context>

<pallas_src>
import jax
import jax.numpy as jnp
from jax.experimental import pallas as pl
from jax.experimental.pallas import tpu as pltpu

# ---- hyper-parameters (BiLSTM(config) with config['embed_dim']=16,
# config['lstm_dim']=32; embed_dim != 300 so the module doubles it) ----------
EMBED_CFG = 16
EMBED = 2 * EMBED_CFG       # = 32, GRU input size
HID = 32                    # lstm_dim (per-direction hidden size)
B = 2                       # batch
T = 8                       # padded sequence length


# ---------------------------------------------------------------------------
# Fused bidirectional-GRU kernel: one grid step == one direction.
# ---------------------------------------------------------------------------
def _bigru_kernel(x_ref, mask_ref, wih_ref, whh_ref, bih_ref, bhh_ref, out_ref):
    """
    x_ref    : (T, B, E)  time-major embeddings (shared by both directions)
    mask_ref : (T, B, 1)  1.0 where t < length[b], else 0.0
    wih_ref  : (E, 3H)    input->gates weights for this direction, gate order r|z|n
    whh_ref  : (H, 3H)    hidden->gates weights
    bih_ref  : (1, 3H)    input bias
    bhh_ref  : (1, 3H)    hidden bias
    out_ref  : (B, H)     final hidden state of this direction
    """
    d = pl.program_id(0)          # 0 = forward, 1 = backward
    n_t = x_ref.shape[0]
    n_b = x_ref.shape[1]

    wih = wih_ref[...]
    whh = whh_ref[...]
    bih = bih_ref[...]
    bhh = bhh_ref[...]

    def step(i, h):
        # forward walks t = 0..T-1, backward walks t = T-1..0.  Masked
        # (padded) steps leave h untouched, reproducing packed-sequence
        # semantics for both directions.
        t = jnp.where(d == 0, i, n_t - 1 - i)
        x_t = x_ref[t]                       # (B, E)
        m_t = mask_ref[t]                    # (B, 1)
        gi = jnp.dot(x_t, wih, preferred_element_type=jnp.float32) + bih   # (B, 3H)
        gh = jnp.dot(h, whh, preferred_element_type=jnp.float32) + bhh     # (B, 3H)
        r = jax.nn.sigmoid(gi[:, 0:HID] + gh[:, 0:HID])
        z = jax.nn.sigmoid(gi[:, HID:2 * HID] + gh[:, HID:2 * HID])
        n = jnp.tanh(gi[:, 2 * HID:3 * HID] + r * gh[:, 2 * HID:3 * HID])
        h_new = (1.0 - z) * n + z * h
        return m_t * h_new + (1.0 - m_t) * h

    h0 = jnp.zeros((n_b, HID), jnp.float32)
    h_final = jax.lax.fori_loop(0, n_t, step, h0, unroll=True)
    out_ref[...] = h_final


# ---------------------------------------------------------------------------
# Wrapper: single pallas_call for the whole BiLSTM.forward (max_pool=False).
# ---------------------------------------------------------------------------
def bilstm_forward(params, embed, lengths):
    """embed: (B, T, E) float32, lengths: (B,) int32 -> (B, 2*HID) float32."""
    b, t, e = embed.shape
    # time-major layout + per-step validity mask (tiny JAX glue, done once)
    x_tm = jnp.transpose(embed, (1, 0, 2)).astype(jnp.float32)               # (T, B, E)
    mask = (jnp.arange(t, dtype=jnp.int32)[None, :] < lengths[:, None])      # (B, T)
    mask_tm = jnp.transpose(mask.astype(jnp.float32), (1, 0))[:, :, None]    # (T, B, 1)

    out = pl.pallas_call(
        _bigru_kernel,
        out_shape=jax.ShapeDtypeStruct((2, b, HID), jnp.float32),
        grid=(2,),
        in_specs=[
            pl.BlockSpec((t, b, e), lambda d: (0, 0, 0)),
            pl.BlockSpec((t, b, 1), lambda d: (0, 0, 0)),
            pl.BlockSpec((pl.Squeezed(), e, 3 * HID), lambda d: (d, 0, 0)),
            pl.BlockSpec((pl.Squeezed(), HID, 3 * HID), lambda d: (d, 0, 0)),
            pl.BlockSpec((pl.Squeezed(), 1, 3 * HID), lambda d: (d, 0, 0)),
            pl.BlockSpec((pl.Squeezed(), 1, 3 * HID), lambda d: (d, 0, 0)),
        ],
        out_specs=pl.BlockSpec((pl.Squeezed(), b, HID), lambda d: (d, 0, 0)),
        compiler_params=pltpu.CompilerParams(
            dimension_semantics=("parallel",)),
    )(x_tm, mask_tm,
      params["w_ih"], params["w_hh"], params["b_ih"], params["b_hh"])

    # torch: out = cat((h_n[forward], h_n[backward]), dim=1)
    return jnp.concatenate([out[0], out[1]], axis=1)                         # (B, 2*HID)


# ---------------------------------------------------------------------------
# Deterministic synthetic parameters (gate order r|z|n, matching torch.nn.GRU;
# weights are stored pre-transposed as (E, 3H)/(H, 3H) and stacked over the
# two directions).
# ---------------------------------------------------------------------------
def init_params(key):
    k = jax.random.split(key, 4)
    s = 1.0 / (HID ** 0.5)

    def u(kk, shape):
        return jax.random.uniform(kk, shape, jnp.float32, -s, s)

    return {
        "w_ih": u(k[0], (2, EMBED, 3 * HID)),
        "w_hh": u(k[1], (2, HID, 3 * HID)),
        "b_ih": u(k[2], (2, 1, 3 * HID)),
        "b_hh": u(k[3], (2, 1, 3 * HID)),
    }


# ---------------------------------------------------------------------------
if __name__ == "__main__":
    key = jax.random.PRNGKey(0)
    k_par, k_emb = jax.random.split(key)

    params = init_params(k_par)
    embed = jax.random.normal(k_emb, (B, T, EMBED), jnp.float32)
    # variable-length, padded batch (element 1 only uses the first 5 steps)
    lengths = jnp.array([T, 5], dtype=jnp.int32)

    out = bilstm_forward(params, embed, lengths)
    out = jax.block_until_ready(out)
    assert out.shape == (B, 2 * HID) and out.dtype == jnp.float32
    assert bool(jnp.all(jnp.isfinite(out)))
    print("KERNEL_OK")
</pallas_src>

<mosaic_0001>
module attributes {stable_mosaic.version = 11 : i64} {
  func.func @_bigru_kernel(%arg0: i32, %arg1: memref<8x2x32xf32, #tpu.memory_space<vmem>>, %arg2: memref<8x2x1xf32, #tpu.memory_space<vmem>>, %arg3: memref<1x32x96xf32, #tpu.memory_space<vmem>>, %arg4: memref<1x32x96xf32, #tpu.memory_space<vmem>>, %arg5: memref<1x1x96xf32, #tpu.memory_space<vmem>>, %arg6: memref<1x1x96xf32, #tpu.memory_space<vmem>>, %arg7: memref<1x2x32xf32, #tpu.memory_space<vmem>>) attributes {dimension_semantics = [#tpu.dimension_semantics<parallel>], iteration_bounds = array<i64: 2>, scalar_prefetch = 0 : i64, scratch_operands = 0 : i64, tpu.core_type = #tpu.core_type<tc>, window_params = [{pipeline_mode = #tpu.pipeline_mode<synchronous>, transform_indices = @transform_0, window_bounds = array<i64: 8, 2, 32>}, {pipeline_mode = #tpu.pipeline_mode<synchronous>, transform_indices = @transform_1, window_bounds = array<i64: 8, 2, 1>}, {transform_indices = @transform_2, window_bounds = array<i64: 1, 32, 96>}, {transform_indices = @transform_3, window_bounds = array<i64: 1, 32, 96>}, {transform_indices = @transform_4, window_bounds = array<i64: 1, 1, 96>}, {transform_indices = @transform_5, window_bounds = array<i64: 1, 1, 96>}, {transform_indices = @transform_6, window_bounds = array<i64: 1, 2, 32>}]} {
    %c0 = arith.constant 0 : index
    %c0_0 = arith.constant 0 : index
    %c0_1 = arith.constant 0 : index
    %0 = vector.load %arg3[%c0, %c0_0, %c0_1] : memref<1x32x96xf32, #tpu.memory_space<vmem>>, vector<1x32x96xf32>
    %1 = vector.shape_cast %0 : vector<1x32x96xf32> to vector<32x96xf32>
    %c0_2 = arith.constant 0 : index
    %c0_3 = arith.constant 0 : index
    %c0_4 = arith.constant 0 : index
    %2 = vector.load %arg4[%c0_2, %c0_3, %c0_4] : memref<1x32x96xf32, #tpu.memory_space<vmem>>, vector<1x32x96xf32>
    %3 = vector.shape_cast %2 : vector<1x32x96xf32> to vector<32x96xf32>
    %c0_5 = arith.constant 0 : index
    %c0_6 = arith.constant 0 : index
    %c0_7 = arith.constant 0 : index
    %4 = vector.load %arg5[%c0_5, %c0_6, %c0_7] : memref<1x1x96xf32, #tpu.memory_space<vmem>>, vector<1x1x96xf32>
    %5 = vector.shape_cast %4 : vector<1x1x96xf32> to vector<1x96xf32>
    %c0_8 = arith.constant 0 : index
    %c0_9 = arith.constant 0 : index
    %c0_10 = arith.constant 0 : index
    %6 = vector.load %arg6[%c0_8, %c0_9, %c0_10] : memref<1x1x96xf32, #tpu.memory_space<vmem>>, vector<1x1x96xf32>
    %7 = vector.shape_cast %6 : vector<1x1x96xf32> to vector<1x96xf32>
    %cst = arith.constant 0.000000e+00 : f32
    %8 = vector.broadcast %cst : f32 to vector<2x32xf32>
    %c0_i32 = arith.constant 0 : i32
    %c0_i32_11 = arith.constant 0 : i32
    %9 = arith.cmpi eq, %arg0, %c0_i32_11 : i32
    %c7_i32 = arith.constant 7 : i32
    %10 = arith.subi %c7_i32, %c0_i32 : i32
    %11 = arith.select %9, %c0_i32, %10 : i32
    %12 = arith.index_cast %11 : i32 to index
    %c0_12 = arith.constant 0 : index
    %c0_13 = arith.constant 0 : index
    %13 = vector.load %arg1[%12, %c0_12, %c0_13] : memref<8x2x32xf32, #tpu.memory_space<vmem>>, vector<1x2x32xf32>
    %14 = vector.shape_cast %13 : vector<1x2x32xf32> to vector<2x32xf32>
    %15 = arith.index_cast %11 : i32 to index
    %c0_14 = arith.constant 0 : index
    %c0_15 = arith.constant 0 : index
    %16 = vector.load %arg2[%15, %c0_14, %c0_15] : memref<8x2x1xf32, #tpu.memory_space<vmem>>, vector<1x2x1xf32>
    %17 = vector.shape_cast %16 : vector<1x2x1xf32> to vector<2x1xf32>
    %cst_16 = arith.constant dense<0.000000e+00> : vector<2x96xf32>
    %18 = tpu.matmul %14, %1, %cst_16 {dimension_numbers = #tpu.dot_dimension_numbers<[1], [0], [0], [1], [0, 0, 1, 1], [], []>} : vector<2x32xf32>, vector<32x96xf32>, vector<2x96xf32> -> vector<2x96xf32>
    %19 = vector.broadcast %5 : vector<1x96xf32> to vector<2x96xf32>
    %20 = arith.addf %18, %19 : vector<2x96xf32>
    %cst_17 = arith.constant dense<0.000000e+00> : vector<2x96xf32>
    %21 = tpu.matmul %8, %3, %cst_17 {dimension_numbers = #tpu.dot_dimension_numbers<[1], [0], [0], [1], [0, 0, 1, 1], [], []>} : vector<2x32xf32>, vector<32x96xf32>, vector<2x96xf32> -> vector<2x96xf32>
    %22 = vector.broadcast %7 : vector<1x96xf32> to vector<2x96xf32>
    %23 = arith.addf %21, %22 : vector<2x96xf32>
    %24 = vector.extract_strided_slice %20 {offsets = [0, 0], sizes = [2, 32], strides = [1, 1]} : vector<2x96xf32> to vector<2x32xf32>
    %25 = vector.extract_strided_slice %23 {offsets = [0, 0], sizes = [2, 32], strides = [1, 1]} : vector<2x96xf32> to vector<2x32xf32>
    %26 = arith.addf %24, %25 : vector<2x32xf32>
    %27 = arith.negf %26 : vector<2x32xf32>
    %28 = math.exp %27 : vector<2x32xf32>
    %cst_18 = arith.constant 1.000000e+00 : f32
    %29 = vector.broadcast %cst_18 : f32 to vector<2x32xf32>
    %30 = arith.addf %29, %28 : vector<2x32xf32>
    %31 = arith.divf %29, %30 : vector<2x32xf32>
    %32 = vector.extract_strided_slice %20 {offsets = [0, 32], sizes = [2, 32], strides = [1, 1]} : vector<2x96xf32> to vector<2x32xf32>
    %33 = vector.extract_strided_slice %23 {offsets = [0, 32], sizes = [2, 32], strides = [1, 1]} : vector<2x96xf32> to vector<2x32xf32>
    %34 = arith.addf %32, %33 : vector<2x32xf32>
    %35 = arith.negf %34 : vector<2x32xf32>
    %36 = math.exp %35 : vector<2x32xf32>
    %cst_19 = arith.constant 1.000000e+00 : f32
    %37 = vector.broadcast %cst_19 : f32 to vector<2x32xf32>
    %38 = arith.addf %37, %36 : vector<2x32xf32>
    %39 = arith.divf %37, %38 : vector<2x32xf32>
    %40 = vector.extract_strided_slice %20 {offsets = [0, 64], sizes = [2, 32], strides = [1, 1]} : vector<2x96xf32> to vector<2x32xf32>
    %41 = vector.extract_strided_slice %23 {offsets = [0, 64], sizes = [2, 32], strides = [1, 1]} : vector<2x96xf32> to vector<2x32xf32>
    %42 = arith.mulf %31, %41 : vector<2x32xf32>
    %43 = arith.addf %40, %42 : vector<2x32xf32>
    %44 = math.tanh %43 : vector<2x32xf32>
    %cst_20 = arith.constant 1.000000e+00 : f32
    %45 = vector.broadcast %cst_20 : f32 to vector<2x32xf32>
    %46 = arith.subf %45, %39 : vector<2x32xf32>
    %47 = arith.mulf %46, %44 : vector<2x32xf32>
    %48 = arith.mulf %39, %8 : vector<2x32xf32>
    %49 = arith.addf %47, %48 : vector<2x32xf32>
    %50 = vector.broadcast %17 : vector<2x1xf32> to vector<2x32xf32>
    %51 = arith.mulf %50, %49 : vector<2x32xf32>
    %cst_21 = arith.constant 1.000000e+00 : f32
    %52 = vector.broadcast %cst_21 : f32 to vector<2x1xf32>
    %53 = arith.subf %52, %17 : vector<2x1xf32>
    %54 = vector.broadcast %53 : vector<2x1xf32> to vector<2x32xf32>
    %55 = arith.mulf %54, %8 : vector<2x32xf32>
    %56 = arith.addf %51, %55 : vector<2x32xf32>
    %c1_i32 = arith.constant 1 : i32
    %c0_i32_22 = arith.constant 0 : i32
    %57 = arith.cmpi eq, %arg0, %c0_i32_22 : i32
    %c7_i32_23 = arith.constant 7 : i32
    %58 = arith.subi %c7_i32_23, %c1_i32 : i32
    %59 = arith.select %57, %c1_i32, %58 : i32
    %60 = arith.index_cast %59 : i32 to index
    %c0_24 = arith.constant 0 : index
    %c0_25 = arith.constant 0 : index
    %61 = vector.load %arg1[%60, %c0_24, %c0_25] : memref<8x2x32xf32, #tpu.memory_space<vmem>>, vector<1x2x32xf32>
    %62 = vector.shape_cast %61 : vector<1x2x32xf32> to vector<2x32xf32>
    %63 = arith.index_cast %59 : i32 to index
    %c0_26 = arith.constant 0 : index
    %c0_27 = arith.constant 0 : index
    %64 = vector.load %arg2[%63, %c0_26, %c0_27] : memref<8x2x1xf32, #tpu.memory_space<vmem>>, vector<1x2x1xf32>
    %65 = vector.shape_cast %64 : vector<1x2x1xf32> to vector<2x1xf32>
    %cst_28 = arith.constant dense<0.000000e+00> : vector<2x96xf32>
    %66 = tpu.matmul %62, %1, %cst_28 {dimension_numbers = #tpu.dot_dimension_numbers<[1], [0], [0], [1], [0, 0, 1, 1], [], []>} : vector<2x32xf32>, vector<32x96xf32>, vector<2x96xf32> -> vector<2x96xf32>
    %67 = vector.broadcast %5 : vector<1x96xf32> to vector<2x96xf32>
    %68 = arith.addf %66, %67 : vector<2x96xf32>
    %cst_29 = arith.constant dense<0.000000e+00> : vector<2x96xf32>
    %69 = tpu.matmul %56, %3, %cst_29 {dimension_numbers = #tpu.dot_dimension_numbers<[1], [0], [0], [1], [0, 0, 1, 1], [], []>} : vector<2x32xf32>, vector<32x96xf32>, vector<2x96xf32> -> vector<2x96xf32>
    %70 = vector.broadcast %7 : vector<1x96xf32> to vector<2x96xf32>
    %71 = arith.addf %69, %70 : vector<2x96xf32>
    %72 = vector.extract_strided_slice %68 {offsets = [0, 0], sizes = [2, 32], strides = [1, 1]} : vector<2x96xf32> to vector<2x32xf32>
    %73 = vector.extract_strided_slice %71 {offsets = [0, 0], sizes = [2, 32], strides = [1, 1]} : vector<2x96xf32> to vector<2x32xf32>
    %74 = arith.addf %72, %73 : vector<2x32xf32>
    %75 = arith.negf %74 : vector<2x32xf32>
    %76 = math.exp %75 : vector<2x32xf32>
    %cst_30 = arith.constant 1.000000e+00 : f32
    %77 = vector.broadcast %cst_30 : f32 to vector<2x32xf32>
    %78 = arith.addf %77, %76 : vector<2x32xf32>
    %79 = arith.divf %77, %78 : vector<2x32xf32>
    %80 = vector.extract_strided_slice %68 {offsets = [0, 32], sizes = [2, 32], strides = [1, 1]} : vector<2x96xf32> to vector<2x32xf32>
    %81 = vector.extract_strided_slice %71 {offsets = [0, 32], sizes = [2, 32], strides = [1, 1]} : vector<2x96xf32> to vector<2x32xf32>
    %82 = arith.addf %80, %81 : vector<2x32xf32>
    %83 = arith.negf %82 : vector<2x32xf32>
    %84 = math.exp %83 : vector<2x32xf32>
    %cst_31 = arith.constant 1.000000e+00 : f32
    %85 = vector.broadcast %cst_31 : f32 to vector<2x32xf32>
    %86 = arith.addf %85, %84 : vector<2x32xf32>
    %87 = arith.divf %85, %86 : vector<2x32xf32>
    %88 = vector.extract_strided_slice %68 {offsets = [0, 64], sizes = [2, 32], strides = [1, 1]} : vector<2x96xf32> to vector<2x32xf32>
    %89 = vector.extract_strided_slice %71 {offsets = [0, 64], sizes = [2, 32], strides = [1, 1]} : vector<2x96xf32> to vector<2x32xf32>
    %90 = arith.mulf %79, %89 : vector<2x32xf32>
    %91 = arith.addf %88, %90 : vector<2x32xf32>
    %92 = math.tanh %91 : vector<2x32xf32>
    %cst_32 = arith.constant 1.000000e+00 : f32
    %93 = vector.broadcast %cst_32 : f32 to vector<2x32xf32>
    %94 = arith.subf %93, %87 : vector<2x32xf32>
    %95 = arith.mulf %94, %92 : vector<2x32xf32>
    %96 = arith.mulf %87, %56 : vector<2x32xf32>
    %97 = arith.addf %95, %96 : vector<2x32xf32>
    %98 = vector.broadcast %65 : vector<2x1xf32> to vector<2x32xf32>
    %99 = arith.mulf %98, %97 : vector<2x32xf32>
    %cst_33 = arith.constant 1.000000e+00 : f32
    %100 = vector.broadcast %cst_33 : f32 to vector<2x1xf32>
    %101 = arith.subf %100, %65 : vector<2x1xf32>
    %102 = vector.broadcast %101 : vector<2x1xf32> to vector<2x32xf32>
    %103 = arith.mulf %102, %56 : vector<2x32xf32>
    %104 = arith.addf %99, %103 : vector<2x32xf32>
    %c2_i32 = arith.constant 2 : i32
    %c0_i32_34 = arith.constant 0 : i32
    %105 = arith.cmpi eq, %arg0, %c0_i32_34 : i32
    %c7_i32_35 = arith.constant 7 : i32
    %106 = arith.subi %c7_i32_35, %c2_i32 : i32
    %107 = arith.select %105, %c2_i32, %106 : i32
    %108 = arith.index_cast %107 : i32 to index
    %c0_36 = arith.constant 0 : index
    %c0_37 = arith.constant 0 : index
    %109 = vector.load %arg1[%108, %c0_36, %c0_37] : memref<8x2x32xf32, #tpu.memory_space<vmem>>, vector<1x2x32xf32>
    %110 = vector.shape_cast %109 : vector<1x2x32xf32> to vector<2x32xf32>
    %111 = arith.index_cast %107 : i32 to index
    %c0_38 = arith.constant 0 : index
    %c0_39 = arith.constant 0 : index
    %112 = vector.load %arg2[%111, %c0_38, %c0_39] : memref<8x2x1xf32, #tpu.memory_space<vmem>>, vector<1x2x1xf32>
    %113 = vector.shape_cast %112 : vector<1x2x1xf32> to vector<2x1xf32>
    %cst_40 = arith.constant dense<0.000000e+00> : vector<2x96xf32>
    %114 = tpu.matmul %110, %1, %cst_40 {dimension_numbers = #tpu.dot_dimension_numbers<[1], [0], [0], [1], [0, 0, 1, 1], [], []>} : vector<2x32xf32>, vector<32x96xf32>, vector<2x96xf32> -> vector<2x96xf32>
    %115 = vector.broadcast %5 : vector<1x96xf32> to vector<2x96xf32>
    %116 = arith.addf %114, %115 : vector<2x96xf32>
    %cst_41 = arith.constant dense<0.000000e+00> : vector<2x96xf32>
    %117 = tpu.matmul %104, %3, %cst_41 {dimension_numbers = #tpu.dot_dimension_numbers<[1], [0], [0], [1], [0, 0, 1, 1], [], []>} : vector<2x32xf32>, vector<32x96xf32>, vector<2x96xf32> -> vector<2x96xf32>
    %118 = vector.broadcast %7 : vector<1x96xf32> to vector<2x96xf32>
    %119 = arith.addf %117, %118 : vector<2x96xf32>
    %120 = vector.extract_strided_slice %116 {offsets = [0, 0], sizes = [2, 32], strides = [1, 1]} : vector<2x96xf32> to vector<2x32xf32>
    %121 = vector.extract_strided_slice %119 {offsets = [0, 0], sizes = [2, 32], strides = [1, 1]} : vector<2x96xf32> to vector<2x32xf32>
    %122 = arith.addf %120, %121 : vector<2x32xf32>
    %123 = arith.negf %122 : vector<2x32xf32>
    %124 = math.exp %123 : vector<2x32xf32>
    %cst_42 = arith.constant 1.000000e+00 : f32
    %125 = vector.broadcast %cst_42 : f32 to vector<2x32xf32>
    %126 = arith.addf %125, %124 : vector<2x32xf32>
    %127 = arith.divf %125, %126 : vector<2x32xf32>
    %128 = vector.extract_strided_slice %116 {offsets = [0, 32], sizes = [2, 32], strides = [1, 1]} : vector<2x96xf32> to vector<2x32xf32>
    %129 = vector.extract_strided_slice %119 {offsets = [0, 32], sizes = [2, 32], strides = [1, 1]} : vector<2x96xf32> to vector<2x32xf32>
    %130 = arith.addf %128, %129 : vector<2x32xf32>
    %131 = arith.negf %130 : vector<2x32xf32>
    %132 = math.exp %131 : vector<2x32xf32>
    %cst_43 = arith.constant 1.000000e+00 : f32
    %133 = vector.broadcast %cst_43 : f32 to vector<2x32xf32>
    %134 = arith.addf %133, %132 : vector<2x32xf32>
    %135 = arith.divf %133, %134 : vector<2x32xf32>
    %136 = vector.extract_strided_slice %116 {offsets = [0, 64], sizes = [2, 32], strides = [1, 1]} : vector<2x96xf32> to vector<2x32xf32>
    %137 = vector.extract_strided_slice %119 {offsets = [0, 64], sizes = [2, 32], strides = [1, 1]} : vector<2x96xf32> to vector<2x32xf32>
    %138 = arith.mulf %127, %137 : vector<2x32xf32>
    %139 = arith.addf %136, %138 : vector<2x32xf32>
    %140 = math.tanh %139 : vector<2x32xf32>
    %cst_44 = arith.constant 1.000000e+00 : f32
    %141 = vector.broadcast %cst_44 : f32 to vector<2x32xf32>
    %142 = arith.subf %141, %135 : vector<2x32xf32>
    %143 = arith.mulf %142, %140 : vector<2x32xf32>
    %144 = arith.mulf %135, %104 : vector<2x32xf32>
    %145 = arith.addf %143, %144 : vector<2x32xf32>
    %146 = vector.broadcast %113 : vector<2x1xf32> to vector<2x32xf32>
    %147 = arith.mulf %146, %145 : vector<2x32xf32>
    %cst_45 = arith.constant 1.000000e+00 : f32
    %148 = vector.broadcast %cst_45 : f32 to vector<2x1xf32>
    %149 = arith.subf %148, %113 : vector<2x1xf32>
    %150 = vector.broadcast %149 : vector<2x1xf32> to vector<2x32xf32>
    %151 = arith.mulf %150, %104 : vector<2x32xf32>
    %152 = arith.addf %147, %151 : vector<2x32xf32>
    %c3_i32 = arith.constant 3 : i32
    %c0_i32_46 = arith.constant 0 : i32
    %153 = arith.cmpi eq, %arg0, %c0_i32_46 : i32
    %c7_i32_47 = arith.constant 7 : i32
    %154 = arith.subi %c7_i32_47, %c3_i32 : i32
    %155 = arith.select %153, %c3_i32, %154 : i32
    %156 = arith.index_cast %155 : i32 to index
    %c0_48 = arith.constant 0 : index
    %c0_49 = arith.constant 0 : index
    %157 = vector.load %arg1[%156, %c0_48, %c0_49] : memref<8x2x32xf32, #tpu.memory_space<vmem>>, vector<1x2x32xf32>
    %158 = vector.shape_cast %157 : vector<1x2x32xf32> to vector<2x32xf32>
    %159 = arith.index_cast %155 : i32 to index
    %c0_50 = arith.constant 0 : index
    %c0_51 = arith.constant 0 : index
    %160 = vector.load %arg2[%159, %c0_50, %c0_51] : memref<8x2x1xf32, #tpu.memory_space<vmem>>, vector<1x2x1xf32>
    %161 = vector.shape_cast %160 : vector<1x2x1xf32> to vector<2x1xf32>
    %cst_52 = arith.constant dense<0.000000e+00> : vector<2x96xf32>
    %162 = tpu.matmul %158, %1, %cst_52 {dimension_numbers = #tpu.dot_dimension_numbers<[1], [0], [0], [1], [0, 0, 1, 1], [], []>} : vector<2x32xf32>, vector<32x96xf32>, vector<2x96xf32> -> vector<2x96xf32>
    %163 = vector.broadcast %5 : vector<1x96xf32> to vector<2x96xf32>
    %164 = arith.addf %162, %163 : vector<2x96xf32>
    %cst_53 = arith.constant dense<0.000000e+00> : vector<2x96xf32>
    %165 = tpu.matmul %152, %3, %cst_53 {dimension_numbers = #tpu.dot_dimension_numbers<[1], [0], [0], [1], [0, 0, 1, 1], [], []>} : vector<2x32xf32>, vector<32x96xf32>, vector<2x96xf32> -> vector<2x96xf32>
    %166 = vector.broadcast %7 : vector<1x96xf32> to vector<2x96xf32>
    %167 = arith.addf %165, %166 : vector<2x96xf32>
    %168 = vector.extract_strided_slice %164 {offsets = [0, 0], sizes = [2, 32], strides = [1, 1]} : vector<2x96xf32> to vector<2x32xf32>
    %169 = vector.extract_strided_slice %167 {offsets = [0, 0], sizes = [2, 32], strides = [1, 1]} : vector<2x96xf32> to vector<2x32xf32>
    %170 = arith.addf %168, %169 : vector<2x32xf32>
    %171 = arith.negf %170 : vector<2x32xf32>
    %172 = math.exp %171 : vector<2x32xf32>
    %cst_54 = arith.constant 1.000000e+00 : f32
    %173 = vector.broadcast %cst_54 : f32 to vector<2x32xf32>
    %174 = arith.addf %173, %172 : vector<2x32xf32>
    %175 = arith.divf %173, %174 : vector<2x32xf32>
    %176 = vector.extract_strided_slice %164 {offsets = [0, 32], sizes = [2, 32], strides = [1, 1]} : vector<2x96xf32> to vector<2x32xf32>
    %177 = vector.extract_strided_slice %167 {offsets = [0, 32], sizes = [2, 32], strides = [1, 1]} : vector<2x96xf32> to vector<2x32xf32>
    %178 = arith.addf %176, %177 : vector<2x32xf32>
    %179 = arith.negf %178 : vector<2x32xf32>
    %180 = math.exp %179 : vector<2x32xf32>
    %cst_55 = arith.constant 1.000000e+00 : f32
    %181 = vector.broadcast %cst_55 : f32 to vector<2x32xf32>
    %182 = arith.addf %181, %180 : vector<2x32xf32>
    %183 = arith.divf %181, %182 : vector<2x32xf32>
    %184 = vector.extract_strided_slice %164 {offsets = [0, 64], sizes = [2, 32], strides = [1, 1]} : vector<2x96xf32> to vector<2x32xf32>
    %185 = vector.extract_strided_slice %167 {offsets = [0, 64], sizes = [2, 32], strides = [1, 1]} : vector<2x96xf32> to vector<2x32xf32>
    %186 = arith.mulf %175, %185 : vector<2x32xf32>
    %187 = arith.addf %184, %186 : vector<2x32xf32>
    %188 = math.tanh %187 : vector<2x32xf32>
    %cst_56 = arith.constant 1.000000e+00 : f32
    %189 = vector.broadcast %cst_56 : f32 to vector<2x32xf32>
    %190 = arith.subf %189, %183 : vector<2x32xf32>
    %191 = arith.mulf %190, %188 : vector<2x32xf32>
    %192 = arith.mulf %183, %152 : vector<2x32xf32>
    %193 = arith.addf %191, %192 : vector<2x32xf32>
    %194 = vector.broadcast %161 : vector<2x1xf32> to vector<2x32xf32>
    %195 = arith.mulf %194, %193 : vector<2x32xf32>
    %cst_57 = arith.constant 1.000000e+00 : f32
    %196 = vector.broadcast %cst_57 : f32 to vector<2x1xf32>
    %197 = arith.subf %196, %161 : vector<2x1xf32>
    %198 = vector.broadcast %197 : vector<2x1xf32> to vector<2x32xf32>
    %199 = arith.mulf %198, %152 : vector<2x32xf32>
    %200 = arith.addf %195, %199 : vector<2x32xf32>
    %c4_i32 = arith.constant 4 : i32
    %c0_i32_58 = arith.constant 0 : i32
    %201 = arith.cmpi eq, %arg0, %c0_i32_58 : i32
    %c7_i32_59 = arith.constant 7 : i32
    %202 = arith.subi %c7_i32_59, %c4_i32 : i32
    %203 = arith.select %201, %c4_i32, %202 : i32
    %204 = arith.index_cast %203 : i32 to index
    %c0_60 = arith.constant 0 : index
    %c0_61 = arith.constant 0 : index
    %205 = vector.load %arg1[%204, %c0_60, %c0_61] : memref<8x2x32xf32, #tpu.memory_space<vmem>>, vector<1x2x32xf32>
    %206 = vector.shape_cast %205 : vector<1x2x32xf32> to vector<2x32xf32>
    %207 = arith.index_cast %203 : i32 to index
    %c0_62 = arith.constant 0 : index
    %c0_63 = arith.constant 0 : index
    %208 = vector.load %arg2[%207, %c0_62, %c0_63] : memref<8x2x1xf32, #tpu.memory_space<vmem>>, vector<1x2x1xf32>
    %209 = vector.shape_cast %208 : vector<1x2x1xf32> to vector<2x1xf32>
    %cst_64 = arith.constant dense<0.000000e+00> : vector<2x96xf32>
    %210 = tpu.matmul %206, %1, %cst_64 {dimension_numbers = #tpu.dot_dimension_numbers<[1], [0], [0], [1], [0, 0, 1, 1], [], []>} : vector<2x32xf32>, vector<32x96xf32>, vector<2x96xf32> -> vector<2x96xf32>
    %211 = vector.broadcast %5 : vector<1x96xf32> to vector<2x96xf32>
    %212 = arith.addf %210, %211 : vector<2x96xf32>
    %cst_65 = arith.constant dense<0.000000e+00> : vector<2x96xf32>
    %213 = tpu.matmul %200, %3, %cst_65 {dimension_numbers = #tpu.dot_dimension_numbers<[1], [0], [0], [1], [0, 0, 1, 1], [], []>} : vector<2x32xf32>, vector<32x96xf32>, vector<2x96xf32> -> vector<2x96xf32>
    %214 = vector.broadcast %7 : vector<1x96xf32> to vector<2x96xf32>
    %215 = arith.addf %213, %214 : vector<2x96xf32>
    %216 = vector.extract_strided_slice %212 {offsets = [0, 0], sizes = [2, 32], strides = [1, 1]} : vector<2x96xf32> to vector<2x32xf32>
    %217 = vector.extract_strided_slice %215 {offsets = [0, 0], sizes = [2, 32], strides = [1, 1]} : vector<2x96xf32> to vector<2x32xf32>
    %218 = arith.addf %216, %217 : vector<2x32xf32>
    %219 = arith.negf %218 : vector<2x32xf32>
    %220 = math.exp %219 : vector<2x32xf32>
    %cst_66 = arith.constant 1.000000e+00 : f32
    %221 = vector.broadcast %cst_66 : f32 to vector<2x32xf32>
    %222 = arith.addf %221, %220 : vector<2x32xf32>
    %223 = arith.divf %221, %222 : vector<2x32xf32>
    %224 = vector.extract_strided_slice %212 {offsets = [0, 32], sizes = [2, 32], strides = [1, 1]} : vector<2x96xf32> to vector<2x32xf32>
    %225 = vector.extract_strided_slice %215 {offsets = [0, 32], sizes = [2, 32], strides = [1, 1]} : vector<2x96xf32> to vector<2x32xf32>
    %226 = arith.addf %224, %225 : vector<2x32xf32>
    %227 = arith.negf %226 : vector<2x32xf32>
    %228 = math.exp %227 : vector<2x32xf32>
    %cst_67 = arith.constant 1.000000e+00 : f32
    %229 = vector.broadcast %cst_67 : f32 to vector<2x32xf32>
    %230 = arith.addf %229, %228 : vector<2x32xf32>
    %231 = arith.divf %229, %230 : vector<2x32xf32>
    %232 = vector.extract_strided_slice %212 {offsets = [0, 64], sizes = [2, 32], strides = [1, 1]} : vector<2x96xf32> to vector<2x32xf32>
    %233 = vector.extract_strided_slice %215 {offsets = [0, 64], sizes = [2, 32], strides = [1, 1]} : vector<2x96xf32> to vector<2x32xf32>
    %234 = arith.mulf %223, %233 : vector<2x32xf32>
    %235 = arith.addf %232, %234 : vector<2x32xf32>
    %236 = math.tanh %235 : vector<2x32xf32>
    %cst_68 = arith.constant 1.000000e+00 : f32
    %237 = vector.broadcast %cst_68 : f32 to vector<2x32xf32>
    %238 = arith.subf %237, %231 : vector<2x32xf32>
    %239 = arith.mulf %238, %236 : vector<2x32xf32>
    %240 = arith.mulf %231, %200 : vector<2x32xf32>
    %241 = arith.addf %239, %240 : vector<2x32xf32>
    %242 = vector.broadcast %209 : vector<2x1xf32> to vector<2x32xf32>
    %243 = arith.mulf %242, %241 : vector<2x32xf32>
    %cst_69 = arith.constant 1.000000e+00 : f32
    %244 = vector.broadcast %cst_69 : f32 to vector<2x1xf32>
    %245 = arith.subf %244, %209 : vector<2x1xf32>
    %246 = vector.broadcast %245 : vector<2x1xf32> to vector<2x32xf32>
    %247 = arith.mulf %246, %200 : vector<2x32xf32>
    %248 = arith.addf %243, %247 : vector<2x32xf32>
    %c5_i32 = arith.constant 5 : i32
    %c0_i32_70 = arith.constant 0 : i32
    %249 = arith.cmpi eq, %arg0, %c0_i32_70 : i32
    %c7_i32_71 = arith.constant 7 : i32
    %250 = arith.subi %c7_i32_71, %c5_i32 : i32
    %251 = arith.select %249, %c5_i32, %250 : i32
    %252 = arith.index_cast %251 : i32 to index
    %c0_72 = arith.constant 0 : index
    %c0_73 = arith.constant 0 : index
    %253 = vector.load %arg1[%252, %c0_72, %c0_73] : memref<8x2x32xf32, #tpu.memory_space<vmem>>, vector<1x2x32xf32>
    %254 = vector.shape_cast %253 : vector<1x2x32xf32> to vector<2x32xf32>
    %255 = arith.index_cast %251 : i32 to index
    %c0_74 = arith.constant 0 : index
    %c0_75 = arith.constant 0 : index
    %256 = vector.load %arg2[%255, %c0_74, %c0_75] : memref<8x2x1xf32, #tpu.memory_space<vmem>>, vector<1x2x1xf32>
    %257 = vector.shape_cast %256 : vector<1x2x1xf32> to vector<2x1xf32>
    %cst_76 = arith.constant dense<0.000000e+00> : vector<2x96xf32>
    %258 = tpu.matmul %254, %1, %cst_76 {dimension_numbers = #tpu.dot_dimension_numbers<[1], [0], [0], [1], [0, 0, 1, 1], [], []>} : vector<2x32xf32>, vector<32x96xf32>, vector<2x96xf32> -> vector<2x96xf32>
    %259 = vector.broadcast %5 : vector<1x96xf32> to vector<2x96xf32>
    %260 = arith.addf %258, %259 : vector<2x96xf32>
    %cst_77 = arith.constant dense<0.000000e+00> : vector<2x96xf32>
    %261 = tpu.matmul %248, %3, %cst_77 {dimension_numbers = #tpu.dot_dimension_numbers<[1], [0], [0], [1], [0, 0, 1, 1], [], []>} : vector<2x32xf32>, vector<32x96xf32>, vector<2x96xf32> -> vector<2x96xf32>
    %262 = vector.broadcast %7 : vector<1x96xf32> to vector<2x96xf32>
    %263 = arith.addf %261, %262 : vector<2x96xf32>
    %264 = vector.extract_strided_slice %260 {offsets = [0, 0], sizes = [2, 32], strides = [1, 1]} : vector<2x96xf32> to vector<2x32xf32>
    %265 = vector.extract_strided_slice %263 {offsets = [0, 0], sizes = [2, 32], strides = [1, 1]} : vector<2x96xf32> to vector<2x32xf32>
    %266 = arith.addf %264, %265 : vector<2x32xf32>
    %267 = arith.negf %266 : vector<2x32xf32>
    %268 = math.exp %267 : vector<2x32xf32>
    %cst_78 = arith.constant 1.000000e+00 : f32
    %269 = vector.broadcast %cst_78 : f32 to vector<2x32xf32>
    %270 = arith.addf %269, %268 : vector<2x32xf32>
    %271 = arith.divf %269, %270 : vector<2x32xf32>
    %272 = vector.extract_strided_slice %260 {offsets = [0, 32], sizes = [2, 32], strides = [1, 1]} : vector<2x96xf32> to vector<2x32xf32>
    %273 = vector.extract_strided_slice %263 {offsets = [0, 32], sizes = [2, 32], strides = [1, 1]} : vector<2x96xf32> to vector<2x32xf32>
    %274 = arith.addf %272, %273 : vector<2x32xf32>
    %275 = arith.negf %274 : vector<2x32xf32>
    %276 = math.exp %275 : vector<2x32xf32>
    %cst_79 = arith.constant 1.000000e+00 : f32
    %277 = vector.broadcast %cst_79 : f32 to vector<2x32xf32>
    %278 = arith.addf %277, %276 : vector<2x32xf32>
    %279 = arith.divf %277, %278 : vector<2x32xf32>
    %280 = vector.extract_strided_slice %260 {offsets = [0, 64], sizes = [2, 32], strides = [1, 1]} : vector<2x96xf32> to vector<2x32xf32>
    %281 = vector.extract_strided_slice %263 {offsets = [0, 64], sizes = [2, 32], strides = [1, 1]} : vector<2x96xf32> to vector<2x32xf32>
    %282 = arith.mulf %271, %281 : vector<2x32xf32>
    %283 = arith.addf %280, %282 : vector<2x32xf32>
    %284 = math.tanh %283 : vector<2x32xf32>
    %cst_80 = arith.constant 1.000000e+00 : f32
    %285 = vector.broadcast %cst_80 : f32 to vector<2x32xf32>
    %286 = arith.subf %285, %279 : vector<2x32xf32>
    %287 = arith.mulf %286, %284 : vector<2x32xf32>
    %288 = arith.mulf %279, %248 : vector<2x32xf32>
    %289 = arith.addf %287, %288 : vector<2x32xf32>
    %290 = vector.broadcast %257 : vector<2x1xf32> to vector<2x32xf32>
    %291 = arith.mulf %290, %289 : vector<2x32xf32>
    %cst_81 = arith.constant 1.000000e+00 : f32
    %292 = vector.broadcast %cst_81 : f32 to vector<2x1xf32>
    %293 = arith.subf %292, %257 : vector<2x1xf32>
    %294 = vector.broadcast %293 : vector<2x1xf32> to vector<2x32xf32>
    %295 = arith.mulf %294, %248 : vector<2x32xf32>
    %296 = arith.addf %291, %295 : vector<2x32xf32>
    %c6_i32 = arith.constant 6 : i32
    %c0_i32_82 = arith.constant 0 : i32
    %297 = arith.cmpi eq, %arg0, %c0_i32_82 : i32
    %c7_i32_83 = arith.constant 7 : i32
    %298 = arith.subi %c7_i32_83, %c6_i32 : i32
    %299 = arith.select %297, %c6_i32, %298 : i32
    %300 = arith.index_cast %299 : i32 to index
    %c0_84 = arith.constant 0 : index
    %c0_85 = arith.constant 0 : index
    %301 = vector.load %arg1[%300, %c0_84, %c0_85] : memref<8x2x32xf32, #tpu.memory_space<vmem>>, vector<1x2x32xf32>
    %302 = vector.shape_cast %301 : vector<1x2x32xf32> to vector<2x32xf32>
    %303 = arith.index_cast %299 : i32 to index
    %c0_86 = arith.constant 0 : index
    %c0_87 = arith.constant 0 : index
    %304 = vector.load %arg2[%303, %c0_86, %c0_87] : memref<8x2x1xf32, #tpu.memory_space<vmem>>, vector<1x2x1xf32>
    %305 = vector.shape_cast %304 : vector<1x2x1xf32> to vector<2x1xf32>
    %cst_88 = arith.constant dense<0.000000e+00> : vector<2x96xf32>
    %306 = tpu.matmul %302, %1, %cst_88 {dimension_numbers = #tpu.dot_dimension_numbers<[1], [0], [0], [1], [0, 0, 1, 1], [], []>} : vector<2x32xf32>, vector<32x96xf32>, vector<2x96xf32> -> vector<2x96xf32>
    %307 = vector.broadcast %5 : vector<1x96xf32> to vector<2x96xf32>
    %308 = arith.addf %306, %307 : vector<2x96xf32>
    %cst_89 = arith.constant dense<0.000000e+00> : vector<2x96xf32>
    %309 = tpu.matmul %296, %3, %cst_89 {dimension_numbers = #tpu.dot_dimension_numbers<[1], [0], [0], [1], [0, 0, 1, 1], [], []>} : vector<2x32xf32>, vector<32x96xf32>, vector<2x96xf32> -> vector<2x96xf32>
    %310 = vector.broadcast %7 : vector<1x96xf32> to vector<2x96xf32>
    %311 = arith.addf %309, %310 : vector<2x96xf32>
    %312 = vector.extract_strided_slice %308 {offsets = [0, 0], sizes = [2, 32], strides = [1, 1]} : vector<2x96xf32> to vector<2x32xf32>
    %313 = vector.extract_strided_slice %311 {offsets = [0, 0], sizes = [2, 32], strides = [1, 1]} : vector<2x96xf32> to vector<2x32xf32>
    %314 = arith.addf %312, %313 : vector<2x32xf32>
    %315 = arith.negf %314 : vector<2x32xf32>
    %316 = math.exp %315 : vector<2x32xf32>
    %cst_90 = arith.constant 1.000000e+00 : f32
    %317 = vector.broadcast %cst_90 : f32 to vector<2x32xf32>
    %318 = arith.addf %317, %316 : vector<2x32xf32>
    %319 = arith.divf %317, %318 : vector<2x32xf32>
    %320 = vector.extract_strided_slice %308 {offsets = [0, 32], sizes = [2, 32], strides = [1, 1]} : vector<2x96xf32> to vector<2x32xf32>
    %321 = vector.extract_strided_slice %311 {offsets = [0, 32], sizes = [2, 32], strides = [1, 1]} : vector<2x96xf32> to vector<2x32xf32>
    %322 = arith.addf %320, %321 : vector<2x32xf32>
    %323 = arith.negf %322 : vector<2x32xf32>
    %324 = math.exp %323 : vector<2x32xf32>
    %cst_91 = arith.constant 1.000000e+00 : f32
    %325 = vector.broadcast %cst_91 : f32 to vector<2x32xf32>
    %326 = arith.addf %325, %324 : vector<2x32xf32>
    %327 = arith.divf %325, %326 : vector<2x32xf32>
    %328 = vector.extract_strided_slice %308 {offsets = [0, 64], sizes = [2, 32], strides = [1, 1]} : vector<2x96xf32> to vector<2x32xf32>
    %329 = vector.extract_strided_slice %311 {offsets = [0, 64], sizes = [2, 32], strides = [1, 1]} : vector<2x96xf32> to vector<2x32xf32>
    %330 = arith.mulf %319, %329 : vector<2x32xf32>
    %331 = arith.addf %328, %330 : vector<2x32xf32>
    %332 = math.tanh %331 : vector<2x32xf32>
    %cst_92 = arith.constant 1.000000e+00 : f32
    %333 = vector.broadcast %cst_92 : f32 to vector<2x32xf32>
    %334 = arith.subf %333, %327 : vector<2x32xf32>
    %335 = arith.mulf %334, %332 : vector<2x32xf32>
    %336 = arith.mulf %327, %296 : vector<2x32xf32>
    %337 = arith.addf %335, %336 : vector<2x32xf32>
    %338 = vector.broadcast %305 : vector<2x1xf32> to vector<2x32xf32>
    %339 = arith.mulf %338, %337 : vector<2x32xf32>
    %cst_93 = arith.constant 1.000000e+00 : f32
    %340 = vector.broadcast %cst_93 : f32 to vector<2x1xf32>
    %341 = arith.subf %340, %305 : vector<2x1xf32>
    %342 = vector.broadcast %341 : vector<2x1xf32> to vector<2x32xf32>
    %343 = arith.mulf %342, %296 : vector<2x32xf32>
    %344 = arith.addf %339, %343 : vector<2x32xf32>
    %c7_i32_94 = arith.constant 7 : i32
    %c0_i32_95 = arith.constant 0 : i32
    %345 = arith.cmpi eq, %arg0, %c0_i32_95 : i32
    %c7_i32_96 = arith.constant 7 : i32
    %346 = arith.subi %c7_i32_96, %c7_i32_94 : i32
    %347 = arith.select %345, %c7_i32_94, %346 : i32
    %348 = arith.index_cast %347 : i32 to index
    %c0_97 = arith.constant 0 : index
    %c0_98 = arith.constant 0 : index
    %349 = vector.load %arg1[%348, %c0_97, %c0_98] : memref<8x2x32xf32, #tpu.memory_space<vmem>>, vector<1x2x32xf32>
    %350 = vector.shape_cast %349 : vector<1x2x32xf32> to vector<2x32xf32>
    %351 = arith.index_cast %347 : i32 to index
    %c0_99 = arith.constant 0 : index
    %c0_100 = arith.constant 0 : index
    %352 = vector.load %arg2[%351, %c0_99, %c0_100] : memref<8x2x1xf32, #tpu.memory_space<vmem>>, vector<1x2x1xf32>
    %353 = vector.shape_cast %352 : vector<1x2x1xf32> to vector<2x1xf32>
    %cst_101 = arith.constant dense<0.000000e+00> : vector<2x96xf32>
    %354 = tpu.matmul %350, %1, %cst_101 {dimension_numbers = #tpu.dot_dimension_numbers<[1], [0], [0], [1], [0, 0, 1, 1], [], []>} : vector<2x32xf32>, vector<32x96xf32>, vector<2x96xf32> -> vector<2x96xf32>
    %355 = vector.broadcast %5 : vector<1x96xf32> to vector<2x96xf32>
    %356 = arith.addf %354, %355 : vector<2x96xf32>
    %cst_102 = arith.constant dense<0.000000e+00> : vector<2x96xf32>
    %357 = tpu.matmul %344, %3, %cst_102 {dimension_numbers = #tpu.dot_dimension_numbers<[1], [0], [0], [1], [0, 0, 1, 1], [], []>} : vector<2x32xf32>, vector<32x96xf32>, vector<2x96xf32> -> vector<2x96xf32>
    %358 = vector.broadcast %7 : vector<1x96xf32> to vector<2x96xf32>
    %359 = arith.addf %357, %358 : vector<2x96xf32>
    %360 = vector.extract_strided_slice %356 {offsets = [0, 0], sizes = [2, 32], strides = [1, 1]} : vector<2x96xf32> to vector<2x32xf32>
    %361 = vector.extract_strided_slice %359 {offsets = [0, 0], sizes = [2, 32], strides = [1, 1]} : vector<2x96xf32> to vector<2x32xf32>
    %362 = arith.addf %360, %361 : vector<2x32xf32>
    %363 = arith.negf %362 : vector<2x32xf32>
    %364 = math.exp %363 : vector<2x32xf32>
    %cst_103 = arith.constant 1.000000e+00 : f32
    %365 = vector.broadcast %cst_103 : f32 to vector<2x32xf32>
    %366 = arith.addf %365, %364 : vector<2x32xf32>
    %367 = arith.divf %365, %366 : vector<2x32xf32>
    %368 = vector.extract_strided_slice %356 {offsets = [0, 32], sizes = [2, 32], strides = [1, 1]} : vector<2x96xf32> to vector<2x32xf32>
    %369 = vector.extract_strided_slice %359 {offsets = [0, 32], sizes = [2, 32], strides = [1, 1]} : vector<2x96xf32> to vector<2x32xf32>
    %370 = arith.addf %368, %369 : vector<2x32xf32>
    %371 = arith.negf %370 : vector<2x32xf32>
    %372 = math.exp %371 : vector<2x32xf32>
    %cst_104 = arith.constant 1.000000e+00 : f32
    %373 = vector.broadcast %cst_104 : f32 to vector<2x32xf32>
    %374 = arith.addf %373, %372 : vector<2x32xf32>
    %375 = arith.divf %373, %374 : vector<2x32xf32>
    %376 = vector.extract_strided_slice %356 {offsets = [0, 64], sizes = [2, 32], strides = [1, 1]} : vector<2x96xf32> to vector<2x32xf32>
    %377 = vector.extract_strided_slice %359 {offsets = [0, 64], sizes = [2, 32], strides = [1, 1]} : vector<2x96xf32> to vector<2x32xf32>
    %378 = arith.mulf %367, %377 : vector<2x32xf32>
    %379 = arith.addf %376, %378 : vector<2x32xf32>
    %380 = math.tanh %379 : vector<2x32xf32>
    %cst_105 = arith.constant 1.000000e+00 : f32
    %381 = vector.broadcast %cst_105 : f32 to vector<2x32xf32>
    %382 = arith.subf %381, %375 : vector<2x32xf32>
    %383 = arith.mulf %382, %380 : vector<2x32xf32>
    %384 = arith.mulf %375, %344 : vector<2x32xf32>
    %385 = arith.addf %383, %384 : vector<2x32xf32>
    %386 = vector.broadcast %353 : vector<2x1xf32> to vector<2x32xf32>
    %387 = arith.mulf %386, %385 : vector<2x32xf32>
    %cst_106 = arith.constant 1.000000e+00 : f32
    %388 = vector.broadcast %cst_106 : f32 to vector<2x1xf32>
    %389 = arith.subf %388, %353 : vector<2x1xf32>
    %390 = vector.broadcast %389 : vector<2x1xf32> to vector<2x32xf32>
    %391 = arith.mulf %390, %344 : vector<2x32xf32>
    %392 = arith.addf %387, %391 : vector<2x32xf32>
    %c8_i32 = arith.constant 8 : i32
    %c0_107 = arith.constant 0 : index
    %c0_108 = arith.constant 0 : index
    %c0_109 = arith.constant 0 : index
    %393 = vector.load %arg7[%c0_107, %c0_108, %c0_109] : memref<1x2x32xf32, #tpu.memory_space<vmem>>, vector<1x2x32xf32>
    %394 = vector.shape_cast %393 : vector<1x2x32xf32> to vector<2x32xf32>
    %395 = vector.shape_cast %392 : vector<2x32xf32> to vector<1x2x32xf32>
    tpu.vector_store %arg7[%c0_107, %c0_108, %c0_109], %395 {strides = array<i32>} : memref<1x2x32xf32, #tpu.memory_space<vmem>>, vector<1x2x32xf32>,
    return
  }
  func.func @transform_0(%arg0: i32) -> (i32, i32, i32) {
    %c0_i32 = arith.constant 0 : i32
    %c0_i32_0 = arith.constant 0 : i32
    %c0_i32_1 = arith.constant 0 : i32
    %c0_i32_2 = arith.constant 0 : i32
    return %c0_i32, %c0_i32_0, %c0_i32_1 : i32, i32, i32
  }
  func.func @transform_1(%arg0: i32) -> (i32, i32, i32) {
    %c0_i32 = arith.constant 0 : i32
    %c0_i32_0 = arith.constant 0 : i32
    %c0_i32_1 = arith.constant 0 : i32
    %c0_i32_2 = arith.constant 0 : i32
    return %c0_i32, %c0_i32_0, %c0_i32_1 : i32, i32, i32
  }
  func.func @transform_2(%arg0: i32) -> (i32, i32, i32) {
    %c0_i32 = arith.constant 0 : i32
    %c0_i32_0 = arith.constant 0 : i32
    %c0_i32_1 = arith.constant 0 : i32
    return %arg0, %c0_i32, %c0_i32_0 : i32, i32, i32
  }
  func.func @transform_3(%arg0: i32) -> (i32, i32, i32) {
    %c0_i32 = arith.constant 0 : i32
    %c0_i32_0 = arith.constant 0 : i32
    %c0_i32_1 = arith.constant 0 : i32
    return %arg0, %c0_i32, %c0_i32_0 : i32, i32, i32
  }
  func.func @transform_4(%arg0: i32) -> (i32, i32, i32) {
    %c0_i32 = arith.constant 0 : i32
    %c0_i32_0 = arith.constant 0 : i32
    %c0_i32_1 = arith.constant 0 : i32
    return %arg0, %c0_i32, %c0_i32_0 : i32, i32, i32
  }
  func.func @transform_5(%arg0: i32) -> (i32, i32, i32) {
    %c0_i32 = arith.constant 0 : i32
    %c0_i32_0 = arith.constant 0 : i32
    %c0_i32_1 = arith.constant 0 : i32
    return %arg0, %c0_i32, %c0_i32_0 : i32, i32, i32
  }
  func.func @transform_6(%arg0: i32) -> (i32, i32, i32) {
    %c0_i32 = arith.constant 0 : i32
    %c0_i32_0 = arith.constant 0 : i32
    %c0_i32_1 = arith.constant 0 : i32
    return %arg0, %c0_i32, %c0_i32_0 : i32, i32, i32
  }
}

</mosaic_0001>

<bundles_post_ra>
// kernel: tpu_custom_call.1
= control target key start
LH: loop header
LB: loop body
LE: loop exit
PB: predicated region body
PF: predicated region fallthrough
CT: control target
= control target key end

     0   :  { %s3283_s0 = inlined_call_operand.vmem [shape: f32[8,2,32], index: 0, kind: input, shape index: {}]   ;;  %s3284_s1 = inlined_call_operand.vmem [shape: f32[8,2,1], index: 1, kind: input, shape index: {}]   ;;  %s3285_s2 = inlined_call_operand.hbm [shape: f32[2,32,96], index: 2, kind: input, shape index: {}]   ;;  %s3286_s3 = inlined_call_operand.hbm [shape: f32[2,32,96], index: 3, kind: input, shape index: {}]   ;;  %s3287_s4 = inlined_call_operand.vmem [shape: f32[2,1,96], index: 4, kind: input, shape index: {}]   ;;  %s3288_s5 = inlined_call_operand.vmem [shape: f32[2,1,96], index: 5, kind: input, shape index: {}]   ;;  %s3289_s6 = inlined_call_operand.hbm [shape: f32[2,2,32], index: 6, kind: output, shape index: {}]  }
   0x1   :  { %3294 = sst [smem:[#allocation11_spill]] %s3285_s2 }
   0x2   :  { %11 = vsyncpa [#allocation3], 0 }
   0x3   :  { %13 = vsyncpa [#allocation3 + $0x1], 0 }
   0x4   :  { %14 = vsyncpa [#allocation6], 0 }
   0x5   :  { %16 = vsyncpa [#allocation6 + $0x1], 0 }
   0x6   :  { %17 = vsyncpa [#allocation4], 0 }
   0x7   :  { %19 = vsyncpa [#allocation4 + $0x1], 0  ;;  %s2766_s21 = smov 0   ;;  %s2768_s22 = smov 0  }
   0x8   :  { %s2770_s23 = smov 0   ;;  %s2772_s24 = smov 0  }
   0x9 LB: > { %s2787_s25 = sadd.s32 4294967295, %s2718_s24   ;;  %s2075_s26 = sadd.s32 4294967294, %s2718_s24   ;;  %s2718_s24 = sphi %s2772_s24, %s3318_s24   ;;  %s2714_s23 = sphi %s2770_s23, %s3317_s23   ;;  %s2710_s22 = sphi %s2768_s22, %s3316_s22   ;;  %s2706_s21 = sphi %s2766_s21, %s3315_s21  }
   0xa   : > { %s2791_s27 = sadd.s32 1, %s2718_s24   ;;  %s74_s28 = sadd.s32 1, %s2714_s23 }
   0xb   : > { %s71_s29 = ssub.s32 %s2718_s24, %s2791_s27  ;;  %p81_p0 = scmp.ne.s32.totalorder %s2714_s23, %s2710_s22 }
   0xc   : > { %p72_p1 = scmp.eq.s32.totalorder %s71_s29, 0  ;;  %p82_p2 = scmp.eq.s32.totalorder %s2718_s24, 0 }
   0xd   : > { %p87_p3 = scmp.ne.s32.totalorder %s2710_s22, %s2706_s21  ;;  %p3290_p4 = scmp.eq.s32.totalorder %s2787_s25, 0 }
   0xe   : > { %s2803_s30 = scalar_select %p72_p1, %s2714_s23, %s74_s28  }
   0xf   : > { %p2805_p5 = por %p82_p2, %p81_p0  ;;  %p2811_p6 = por %p3290_p4, %p87_p3 }
  0x10   : > { %p189_p7 = scmp.eq.s32.totalorder %s2787_s25, 1  ;;  %p195_p8 = scmp.eq.s32.totalorder %s2075_s26, 1 }
  0x11   : > { %s3296_s8 = scalar_select %p2811_p6, 1, 0 }
  0x12   : > { %p2496_p10 = scmp.lt.s32.totalorder %s2718_s24, 2  ;;  %p2818_p11 = por %p189_p7, %p81_p0 }
  0x13   : > { %p2822_p12 = por %p195_p8, %p87_p3  ;;  %s2827_s11 = sand.u32 1, %s2714_s23  }
  0x14   : > { %s3297_s9 = scalar_select %p2818_p11, 1, 0 }
  0x15   : > { %s3298_s10 = scalar_select %p2822_p12, 1, 0 }
  0x16   : > { %s2125_s12 = sshll.u32 %s2718_s24, 9  ;;  %s2078_s13 = sshll.u32 %s2827_s11, 5 }
  0x17   : > { %s3299_s2 = sld [smem:[#allocation11_spill]]  ;;  %s225_s17 = scalar_lea.vmem [#allocation2], %s2078_s13 }
  0x18   : > { %s232_s18 = sshll.u32 %s225_s17, 4  ;;  %p2842_p13 = pnand %p2496_p10, %p2805_p5  ;;  %s2846_s18 = int_to_ptr.vmem [resolvable:$true] %s232_s18 }
  0x19   : > { %s222_s20 = scalar_lea.sflag [#allocation3], %s2827_s11 }
  0x1a   : > { %p2590_p1 = pneg %p2842_p13 }
  0x1d   : > { %s2836_s16 = scalar_lea.hbm %s3299_s2, %s2125_s12  ;;  %s2593_s7 = scalar_lea.hbm %s3299_s2, 1024 }
  0x1e   : > { %s2588_s26 = scalar_lea.hbm %s2836_s16, 512  ;;  %p2594_p5 = scmp.lt.u32.totalorder %s2836_s16, %s3299_s2 }
  0x1f   : > { %p2589_p0 = scmp.ne.s32.totalorder %s2836_s16, %s2588_s26  ;;  %p2595_p7 = scmp.lt.u32.totalorder %s2593_s7, %s2588_s26 }
  0x20   : > { %p2597_p10 = scmp.lt.u32.totalorder %s2588_s26, %s2836_s16 }
  0x21   : > { %p2591_p2 = pnand %p2590_p1, %p2589_p0  ;;  %p2596_p8 = por %p2595_p7, %p2594_p5 }
  0x23   : > { %p2592_p3 = pneg %p2591_p2  ;;  %p2598_p9 = por %p2597_p10, %p2596_p8 }
  0x25   : > { %p2599_p4 = pnand %p2598_p9, %p2592_p3 }
  0x27   : > { %2602 = shalt.err (!%p2599_p4)
}
  0x28   : > { %s2603_s17 = scalar_lea.vmem %s2846_s18, 512  ;;  %s2720_s28 = smov [#allocation2]  }
  0x29   : > { %p2604_p0 = scmp.ne.s32.totalorder %s2846_s18, %s2603_s17  ;;  %s2608_s29 = sshll.u32 %s2720_s28, 4  ;;  %s2609_s29 = int_to_ptr.vmem [resolvable:$false] %s2608_s29 }
  0x2a   : > { %s2610_s14 = scalar_lea.vmem %s2609_s29, 1024  ;;  %p2611_p11 = scmp.lt.s32.totalorder %s2846_s18, %s2609_s29 }
  0x2b   : > { %p2606_p2 = pnand %p2604_p0, %p2590_p1  ;;  %p2612_p5 = scmp.lt.s32.totalorder %s2610_s14, %s2603_s17 }
  0x2d   : > { %p2607_p12 = pneg %p2606_p2  ;;  %p2613_p7 = por %p2612_p5, %p2611_p11 }
  0x2f   : > { %p2614_p8 = pnand %p2613_p7, %p2607_p12 }
  0x31   : > { %2617 = shalt.err (!%p2614_p8)
}
  0x32   : > { %s3292_s26 = smov 128   ;;  %s2722_s7 = smov 8  }
  0x33   : > { %2488 = dma.hbm_to_vmem [thread:$0]  (!%p2842_p13), %s2836_s16, 512, %s2846_s18, %s222_s20, %s3292_s26, %s3292_s26, %s2722_s7  }
  0x34   : > { %p2084_p4 = scmp.ge.s32.totalorder %s2718_s24, 1  ;;  %p273_p9 = scmp.lt.s32.totalorder %s2718_s24, 3 }
  0x35   : > { %s2890_s29 = scalar_lea.hbm %s3286_s3, %s2125_s12  ;;  %s246_s14 = scalar_lea.vmem [#allocation5], %s2078_s13 }
  0x36   : > { %p2881_p11 = pnand %p2084_p4, %p273_p9  ;;  %s253_s2 = sshll.u32 %s246_s14, 4  ;;  %s2894_s2 = int_to_ptr.vmem [resolvable:$true] %s253_s2 }
  0x37   : > { %s243_s16 = scalar_lea.sflag [#allocation6], %s2827_s11  ;;  %s2618_s18 = scalar_lea.hbm %s2890_s29, 512 }
  0x38   : > { %p2619_p12 = scmp.ne.s32.totalorder %s2890_s29, %s2618_s18  ;;  %s2623_s12 = scalar_lea.hbm %s3286_s3, 1024 }
  0x39   : > { %p2624_p0 = scmp.lt.u32.totalorder %s2890_s29, %s3286_s3  ;;  %p2625_p2 = scmp.lt.u32.totalorder %s2623_s12, %s2618_s18 }
  0x3a   : > { %p2621_p3 = pnand %p2619_p12, %p2590_p1  ;;  %p2627_p7 = scmp.lt.u32.totalorder %s2618_s18, %s2890_s29 }
  0x3b   : > { %p2626_p5 = por %p2625_p2, %p2624_p0 }
  0x3c   : > { %p2622_p10 = pneg %p2621_p3 }
  0x3d   : > { %p2628_p8 = por %p2627_p7, %p2626_p5 }
  0x3f   : > { %p2629_p4 = pnand %p2628_p8, %p2622_p10 }
  0x41   : > { %2632 = shalt.err (!%p2629_p4)
}
  0x42   : > { %s2633_s13 = scalar_lea.vmem %s2894_s2, 512  ;;  %s2723_s14 = smov [#allocation5]  }
  0x43   : > { %p2634_p9 = scmp.ne.s32.totalorder %s2894_s2, %s2633_s13  ;;  %s2638_s20 = sshll.u32 %s2723_s14, 4  ;;  %s2639_s20 = int_to_ptr.vmem [resolvable:$false] %s2638_s20 }
  0x44   : > { %s2640_s26 = scalar_lea.vmem %s2639_s20, 1024  ;;  %p2641_p6 = scmp.lt.s32.totalorder %s2894_s2, %s2639_s20 }
  0x45   : > { %p2636_p12 = pnand %p2634_p9, %p2590_p1  ;;  %p2642_p0 = scmp.lt.s32.totalorder %s2640_s26, %s2633_s13 }
  0x47   : > { %p2637_p3 = pneg %p2636_p12  ;;  %p2643_p2 = por %p2642_p0, %p2641_p6 }
  0x49   : > { %p2644_p5 = pnand %p2643_p2, %p2637_p3 }
  0x4b   : > { %2647 = shalt.err (!%p2644_p5)
}
  0x4c   : > { %s3302_s18 = smov 128   ;;  %277 = sbr.rel (%p2881_p11) target bundleno = 5688 (0x1638), region = 44 }
  0x4d   : > { %2491 = dma.hbm_to_vmem [thread:$0]  (!%p2842_p13), %s2890_s29, 512, %s2894_s2, %s243_s16, %s3302_s18, %s3302_s18, %s2722_s7  }
  0x4e   : > { %s2928_s17 = sand.u32 (!%p2881_p11), 1, %s2710_s22   ;;  %p3303_p6 = scmp.ne.s32.totalorder (!%p2881_p11), %s3296_s8, 0 }
  0x4f   : > { %s2085_s12 = sshll.u32 (!%p2881_p11), %s2928_s17, 5  ;;  %s280_s28 = scalar_lea.sflag (!%p2881_p11), [#allocation3], %s2928_s17 }
  0x50   : > { %s283_s19 = scalar_lea.vmem (!%p2881_p11), [#allocation2], %s2085_s12 }
  0x53   : > { %2693 = dma.done.wait (%p3303_p6), %s280_s28, 512  }
  0x54   : > { %2695 = vsyncadd (%p3303_p6), %s280_s28, 4294966784  ;;  %s289_s2 = scalar_lea.sflag [#allocation6], %s2928_s17  ;;  %s292_s11 = scalar_lea.vmem [#allocation5], %s2085_s12 }
  0x55   : > { %2697 = dma.done.wait (%p3303_p6), %s289_s2, 512  }
  0x56   : > { %2699 = vsyncadd (%p3303_p6), %s289_s2, 4294966784  ;;  %v2724_v0 = vmov 0.0|0.0   ;;  %vm2725_vm0 = vmmov 0   ;;  %v2726_v1 = vmov 0.0   ;;  %p3304_p13 = scmp.eq.s32.totalorder %s2787_s25, 0  ;;  %v338_v2 = vld [vmem:[%s283_s19] sm:$0xff] }
  0x57   : > { %2383 = vmatprep.subr.bf16.mxu0 %v2724_v0  ;;  %2389 = vmatprep.subr.bf16.mxu1 %v2724_v0  ;;  %v339_v3 = vld [vmem:[%s283_s19 + $0x8] sm:$0xff]  ;;  %v342_v4 = vld [vmem:[%s292_s11] sm:$0xff]  ;;  %v340_v7 = vld [vmem:[%s283_s19 + $0x10] sm:$0xff]  ;;  %vm361_vm1 = vcmask 261120   ;;  %p332_p1 = scmp.lt.s32.totalorder %s2787_s25, 1  ;;  %v2727_v15 = vmov 0  }
  0x58   : > { %2215 = vmatprep.mubr.msk.f32.mxu0 %vm2725_vm0, %v2726_v1  ;;  %2226 = vmatprep.mubr.msk.f32.mxu1 %vm2725_vm0, %v2726_v1  ;;  %s2949_s7 = scalar_select %p3304_p13, 0, 7  ;;  %v2951_v5 = vpack.c.bf16 %v339_v3, %v338_v2  ;;  %v343_v6 = vld [vmem:[%s292_s11 + $0x8] sm:$0xff]  ;;  %v341_v8 = vld [vmem:[%s283_s19 + $0x18] sm:$0xff]  ;;  %v344_v10 = vld [vmem:[%s292_s11 + $0x10] sm:$0xff]  ;;  %vm1916_vm2 = vcmask 254976  }
  0x59   : > { %v2954_v9 = vpack.c.bf16 %v343_v6, %v342_v4  ;;  %v345_v11 = vld [vmem:[%s292_s11 + $0x18] sm:$0xff]  ;;  %v2957_v12 = vpack.c.bf16 %v341_v8, %v340_v7  ;;  %s333_s13 = scalar_select %p332_p1, %s2787_s25, 1  ;;  %2538 = vset.pattern.permute.xlu1 %v2727_v15  ;;  %2539 = vset.pattern.permute.xlu0 %v2727_v15 }
  0x5a   : > { %s2088_s8 = sshll.u32 %s2949_s7, 1  ;;  %2385 = vmatpush3.bf16.msra.mxu0 %v2951_v5  ;;  %v2961_v13 = vpack.c.bf16 %v345_v11, %v344_v10  ;;  %s2728_s19 = smov 64  }
  0x5b   : > { %2391 = vmatpush3.bf16.msra.mxu1 %v2954_v9  ;;  %2386 = vmatprep.subr.bf16.mxu0 %v2724_v0  ;;  %s351_s16 = scalar_lea.vmem %s3283_s0, %s2088_s8  ;;  %s353_s26 = scalar_lea.vmem %s3284_s1, %s2088_s8 }
  0x5c   : > { %2392 = vmatprep.subr.bf16.mxu1 %v2724_v0  ;;  %v352_v14 = vld [vmem:[%s351_s16] sm:$0x3]  ;;  %s337_s28 = scalar_lea.vmem %s3288_s5, %s333_s13  ;;  %s334_s7 = scalar_lea.vmem %s3287_s4, %s333_s13 }
  0x5d   : > { %v354_v16 = vld [vmem:[%s353_s26] sm:$0x3]  ;;  %s2729_s8 = smov 96   ;;  %p3305_p11 = pmov %p3304_p13 }
  0x5e   : > { %2388 = vmatpush3.bf16.msra.mxu0 %v2957_v12  ;;  %542 = vperm.xlu1 %2538, %v354_v16   ;;  %v546_v17 = vsub.f32 1.0, %v354_v16  ;;  %v2997_v18 = vld [vmem:[%s337_s28] ss:$0 sm:$0xff]  ;;  %p3312_p0 = scmp.ne.s32.totalorder %s3297_s9, 0 }
  0x5f   : > { %2394 = vmatpush3.bf16.msra.mxu1 %v2961_v13  ;;  %2395 = vmatprep.subr.bf16.mxu0 %v2724_v0  ;;  %v3004_v24 = vld [vmem:[%s334_s7] ss:$0 sm:$0xff]  ;;  %s3011_s15 = scalar_select %p3305_p11, 1, 6 }
  0x60   : > { %2401 = vmatprep.subr.bf16.mxu1 %v2724_v0  ;;  %p3306_p10 = pmov %p3305_p11 }
  0x61   : > { %2216 = vmatmul.mubr.msk.f32.vlgmr.msra.gmra.mrb[0].mxu0 %vm361_vm1, %v352_v14  ;;  %s2093_s29 = sshll.u32 %s3011_s15, 1 }
  0x62   : > { %2227 = vmatmul.mubr.f32.vlgmr.msra.gmra.mrb[0].mxu1 %v2726_v1  ;;  %2397 = vmatpush3.bf16.msra.mxu0 %v2951_v5  ;;  %s556_s14 = scalar_lea.vmem %s3283_s0, %s2093_s29  ;;  %s558_s18 = scalar_lea.vmem %s3284_s1, %s2093_s29 }
  0x63   : > { %2403 = vmatpush3.bf16.msra.mxu1 %v2954_v9  ;;  %2398 = vmatprep.subr.bf16.mxu0 %v2724_v0  ;;  %v557_v36 = vld [vmem:[%s556_s14] sm:$0x3]  ;;  %s3046_s12 = scalar_select %p3306_p10, 2, 5 }
  0x64   : > { %2404 = vmatprep.subr.bf16.mxu1 %v2724_v0  ;;  %2237 = vmatprep.mubr.msk.f32.mxu0 %vm2725_vm0, %v2726_v1  ;;  %v559_v53 = vld [vmem:[%s558_s18] sm:$0x3]  ;;  %p3307_p7 = pmov %p3306_p10 }
  0x65   : > { %2248 = vmatprep.mubr.msk.f32.mxu1 %vm2725_vm0, %v2726_v1  ;;  %549 = vperm.xlu1 %2538, %v546_v17   ;;  %v740_v62 = vsub.f32 1.0, %v559_v53  ;;  %s2097_s28 = sshll.u32 %s3046_s12, 1 }
  0x66   : > { %2400 = vmatpush3.bf16.msra.mxu0 %v2957_v12  ;;  %s750_s7 = scalar_lea.vmem %s3283_s0, %s2097_s28  ;;  %s752_s16 = scalar_lea.vmem %s3284_s1, %s2097_s28 }
  0x67   : > { %2406 = vmatpush3.bf16.msra.mxu1 %v2961_v13  ;;  %2407 = vmatprep.subr.bf16.mxu0 %v2724_v0  ;;  %v751_v4 = vld [vmem:[%s750_s7] sm:$0x3]  ;;  %s3081_s13 = scalar_select %p3307_p7, 3, 4 }
  0x68   : > { %2413 = vmatprep.subr.bf16.mxu1 %v2724_v0  ;;  %p3308_p8 = pmov %p3307_p7  ;;  %p3309_p4 = pmov %p3307_p7 }
  0x69   : > { %2238 = vmatmul.mubr.msk.f32.vlgmr.msra.gmra.mrb[2].mxu0 %vm361_vm1, %v557_v36  ;;  %s2101_s14 = sshll.u32 %s3081_s13, 1 }
  0x6a   : > { %2409 = vmatpush3.bf16.msra.mxu0 %v2951_v5  ;;  %2259 = vmatprep.mubr.msk.f32.mxu0 %vm2725_vm0, %v2726_v1  ;;  %s944_s18 = scalar_lea.vmem %s3283_s0, %s2101_s14  ;;  %s946_s2 = scalar_lea.vmem %s3284_s1, %s2101_s14 }
  0x6b   : > { %2410 = vmatprep.subr.bf16.mxu0 %v2724_v0  ;;  %s3116_s11 = scalar_select %p3308_p8, 4, 3 }
  0x6c   : > { %s3151_s26 = scalar_select %p3309_p4, 5, 2 }
  0x6d   : > { %s2105_s7 = sshll.u32 %s3116_s11, 1  ;;  %p3310_p9 = pmov %p3309_p4 }
  0x6e   : > { %2412 = vmatpush3.bf16.msra.mxu0 %v2957_v12  ;;  %s1140_s20 = scalar_lea.vmem %s3284_s1, %s2105_s7  ;;  %p3311_p12 = pmov %p3309_p4 }
  0x6f   : > { %2419 = vmatprep.subr.bf16.mxu0 %v2724_v0  ;;  %s3186_s29 = scalar_select %p3310_p9, 6, 1 }
  0x70   : > { %s1718_s28 = scalar_select %p3311_p12, 7, 0 }
  0x71   : > { %2260 = vmatmul.mubr.msk.f32.vlgmr.msra.gmra.mrb[4].mxu0 %vm361_vm1, %v751_v4  ;;  %s2122_s14 = sshll.u32 %s2787_s25, 5  ;;  %s2730_s25 = smov [#allocation7]  }
  0x72   : > { %2421 = vmatpush3.bf16.msra.mxu0 %v2951_v5  ;;  %2281 = vmatprep.mubr.msk.f32.mxu0 %vm2725_vm0, %v2726_v1 }
  0x73   : > { %2422 = vmatprep.subr.bf16.mxu0 %v2724_v0 }
  0x76   : > { %2424 = vmatpush3.bf16.msra.mxu0 %v2957_v12 }
  0x77   : > { %2431 = vmatprep.subr.bf16.mxu0 %v2724_v0 }
  0xdd   : > { %v543_v37 = vpop.permute.xlu1 %542 }
  0xe4   : > { %v550_v42 = vpop.permute.xlu1 %549 }
  0xe5   : > { %v552_v44 = vmul.f32 0.0, %v550_v42 }
 0x134   : > { %v431_v19 = vpop.f32.mrb[0].mxu0 }
 0x135   : > { %v510_v20 = vpop.f32.mrb[0].mxu1  ;;  %v2217_v21 = vpop.f32.mrb[1].mxu0  ;;  %v432_v25 = vadd.f32 %v3004_v24, %v431_v19 }
 0x136   : > { %v511_v22 = vadd.f32 %v2997_v18, %v510_v20  ;;  %v2228_v23 = vpop.f32.mrb[1].mxu1 }
 0x138   : > { %522 = vrot.lane.b32.xlu0 %v511_v22, %s2728_s19  ;;  %v514_v26 = vadd.f32 %v511_v22, %v432_v25 }
 0x13a   : > { %v2092_v27 = vmul.f32 -1.442695, %v514_v26 }
 0x13c   : > { %2540 = vpow2.f32 %v2092_v27  ;;  %v629_v48 = vpop.f32.mrb[2].mxu0  ;;  %v753_v27 = vld [vmem:[%s752_s16] sm:$0x3]  ;;  %s1138_s16 = scalar_lea.vmem %s3283_s0, %s2105_s7 }
 0x13d   : > { %v2239_v49 = vpop.f32.mrb[3].mxu0  ;;  %v630_v54 = vadd.f32 %v3004_v24, %v629_v48  ;;  %v934_v36 = vsub.f32 1.0, %v753_v27 }
 0x144   : > { %v823_v21 = vpop.f32.mrb[4].mxu0 }
 0x145   : > { %v2261_v22 = vpop.f32.mrb[5].mxu0 }
 0x146   : > { %v2541_v28 = vpop.eup %2540 }
 0x147   : > { %v518_v29 = vadd.f32 1.0, %v2541_v28  ;;  %v824_v28 = vadd.f32 %v3004_v24, %v823_v21 }
 0x149   : > { %2542 = vrcp.f32 %v518_v29 }
 0x153   : > { %v2543_v30 = vpop.eup %2542 }
 0x154   : > { %v532_v38 = vsub.f32 1.0, %v2543_v30  ;;  %v538_v40 = vmul.f32 0.0, %v2543_v30 }
 0x1aa   : > { %v523_v31 = vpop.permute.xlu0 %522 }
 0x1ab   : > { %v525_v32 = vmul.f32 %v2543_v30, %v523_v31 }
 0x1ad   : > { %527 = vrot.lane.b32.xlu0 %v525_v32, %s2728_s19 }
 0x21f   : > { %v528_v33 = vpop.permute.xlu0 %527 }
 0x220   : > { %v530_v34 = vadd.f32 %v528_v33, %v432_v25 }
 0x222   : > { %2544 = vtanh.f32 %v530_v34 }
 0x22c   : > { %v2545_v35 = vpop.eup %2544 }
 0x22d   : > { %534 = vrot.lane.b32.xlu0 %v2545_v35, %s2729_s8 }
 0x29f   : > { %v535_v39 = vpop.permute.xlu0 %534 }
 0x2a0   : > { %v537_v41 = vmul.f32 %v535_v39, %v532_v38 }
 0x2a2   : > { %v539_v43 = vadd.f32 %v538_v40, %v537_v41  ;;  %v945_v40 = vld [vmem:[%s944_s18] sm:$0x3]  ;;  %s2109_s18 = sshll.u32 %s3151_s26, 1 }
 0x2a3   : > { %2282 = vmatmul.mubr.msk.f32.vlgmr.msra.gmra.mrb[6].mxu0 %vm361_vm1, %v945_v40  ;;  %s1334_s15 = scalar_lea.vmem %s3284_s1, %s2109_s18 }
 0x2a4   : > { %v545_v45 = vmul.f32 %v543_v37, %v539_v43  ;;  %2433 = vmatpush3.bf16.msra.mxu0 %v2951_v5  ;;  %2303 = vmatprep.mubr.msk.f32.mxu0 %vm2725_vm0, %v2726_v1 }
 0x2a5   : > { %2434 = vmatprep.subr.bf16.mxu0 %v2724_v0 }
 0x2a6   : > { %v553_v46 = vadd.f32 %v552_v44, %v545_v45 }
 0x2a8   : > { %634 = vrot.lane.b32.xlu1 %v553_v46, %s2729_s8  ;;  %2436 = vmatpush3.bf16.msra.mxu0 %v2957_v12 }
 0x2a9   : > { %2443 = vmatprep.subr.bf16.mxu0 %v2724_v0 }
 0x31a   : > { %v635_v47 = vpop.permute.xlu1 %634 }
 0x31b   : > { %2249 = vmatmul.mubr.msk.f32.vlgmr.msra.gmra.mrb[2].mxu1 %vm361_vm1, %v635_v47 }
 0x31c   : > { %2415 = vmatpush3.bf16.msra.mxu1 %v2954_v9  ;;  %2270 = vmatprep.mubr.msk.f32.mxu1 %vm2725_vm0, %v2726_v1 }
 0x31d   : > { %2416 = vmatprep.subr.bf16.mxu1 %v2724_v0 }
 0x320   : > { %2418 = vmatpush3.bf16.msra.mxu1 %v2961_v13 }
 0x321   : > { %2425 = vmatprep.subr.bf16.mxu1 %v2724_v0 }
 0x3ee   : > { %v704_v50 = vpop.f32.mrb[2].mxu1 }
 0x3ef   : > { %v705_v51 = vadd.f32 %v2997_v18, %v704_v50  ;;  %v2250_v52 = vpop.f32.mrb[3].mxu1 }
 0x3f0   : > { %v1017_v52 = vpop.f32.mrb[6].mxu0 }
 0x3f1   : > { %716 = vrot.lane.b32.xlu0 %v705_v51, %s2728_s19  ;;  %v708_v55 = vadd.f32 %v705_v51, %v630_v54 }
 0x3f3   : > { %v2096_v56 = vmul.f32 -1.442695, %v708_v55 }
 0x3f5   : > { %736 = vperm.xlu0 %2539, %v559_v53   ;;  %2546 = vpow2.f32 %v2096_v56  ;;  %v2283_v53 = vpop.f32.mrb[7].mxu0 }
 0x3ff   : > { %v2547_v57 = vpop.eup %2546 }
 0x400   : > { %v712_v58 = vadd.f32 1.0, %v2547_v57  ;;  %v947_v57 = vld [vmem:[%s946_s2] sm:$0x3]  ;;  %s1332_s2 = scalar_lea.vmem %s3283_s0, %s2109_s18 }
 0x401   : > { %v1128_v4 = vsub.f32 1.0, %v947_v57 }
 0x402   : > { %2548 = vrcp.f32 %v712_v58  ;;  %v1018_v58 = vadd.f32 %v3004_v24, %v1017_v52 }
 0x40c   : > { %v2549_v59 = vpop.eup %2548 }
 0x40d   : > { %v726_v7 = vsub.f32 1.0, %v2549_v59  ;;  %v732_v11 = vmul.f32 %v2549_v59, %v553_v46 }
 0x463   : > { %v717_v60 = vpop.permute.xlu0 %716 }
 0x464   : > { %v719_v61 = vmul.f32 %v2549_v59, %v717_v60 }
 0x466   : > { %721 = vrot.lane.b32.xlu1 %v719_v61, %s2728_s19 }
 0x46a   : > { %743 = vperm.xlu1 %2538, %v740_v62  }
 0x474   : > { %v737_v14 = vpop.permute.xlu0 %736 }
 0x4d8   : > { %v722_v63 = vpop.permute.xlu1 %721 }
 0x4d9   : > { %v724_v2 = vadd.f32 %v722_v63, %v630_v54 }
 0x4db   : > { %2550 = vtanh.f32 %v724_v2 }
 0x4e5   : > { %v2551_v3 = vpop.eup %2550 }
 0x4e6   : > { %728 = vrot.lane.b32.xlu1 %v2551_v3, %s2729_s8 }
 0x4e9   : > { %v744_v6 = vpop.permute.xlu1 %743 }
 0x4ea   : > { %v746_v16 = vmul.f32 %v744_v6, %v553_v46 }
 0x558   : > { %v729_v8 = vpop.permute.xlu1 %728 }
 0x559   : > { %v731_v10 = vmul.f32 %v729_v8, %v726_v7 }
 0x55b   : > { %v733_v15 = vadd.f32 %v732_v11, %v731_v10  ;;  %v1139_v10 = vld [vmem:[%s1138_s16] sm:$0x3]  ;;  %s2113_s16 = sshll.u32 %s3186_s29, 1 }
 0x55c   : > { %2304 = vmatmul.mubr.msk.f32.vlgmr.msra.gmra.mrb[8].mxu0 %vm361_vm1, %v1139_v10  ;;  %s1528_s12 = scalar_lea.vmem %s3284_s1, %s2113_s16 }
 0x55d   : > { %v739_v17 = vmul.f32 %v737_v14, %v733_v15  ;;  %2445 = vmatpush3.bf16.msra.mxu0 %v2951_v5  ;;  %2325 = vmatprep.mubr.msk.f32.mxu0 %vm2725_vm0, %v2726_v1 }
 0x55e   : > { %2446 = vmatprep.subr.bf16.mxu0 %v2724_v0 }
 0x55f   : > { %v747_v19 = vadd.f32 %v746_v16, %v739_v17 }
 0x561   : > { %828 = vrot.lane.b32.xlu0 %v747_v19, %s2729_s8  ;;  %2448 = vmatpush3.bf16.msra.mxu0 %v2957_v12 }
 0x562   : > { %2455 = vmatprep.subr.bf16.mxu0 %v2724_v0 }
 0x5d3   : > { %v829_v20 = vpop.permute.xlu0 %828 }
 0x5d4   : > { %2271 = vmatmul.mubr.msk.f32.vlgmr.msra.gmra.mrb[4].mxu1 %vm361_vm1, %v829_v20 }
 0x5d5   : > { %2427 = vmatpush3.bf16.msra.mxu1 %v2954_v9  ;;  %2292 = vmatprep.mubr.msk.f32.mxu1 %vm2725_vm0, %v2726_v1 }
 0x5d6   : > { %2428 = vmatprep.subr.bf16.mxu1 %v2724_v0 }
 0x5d9   : > { %2430 = vmatpush3.bf16.msra.mxu1 %v2961_v13 }
 0x5da   : > { %2437 = vmatprep.subr.bf16.mxu1 %v2724_v0 }
 0x6a7   : > { %v898_v23 = vpop.f32.mrb[4].mxu1 }
 0x6a8   : > { %v899_v25 = vadd.f32 %v2997_v18, %v898_v23  ;;  %v2272_v26 = vpop.f32.mrb[5].mxu1 }
 0x6a9   : > { %v1211_v26 = vpop.f32.mrb[8].mxu0 }
 0x6aa   : > { %910 = vrot.lane.b32.xlu1 %v899_v25, %s2728_s19  ;;  %v902_v29 = vadd.f32 %v899_v25, %v824_v28 }
 0x6ac   : > { %v2100_v30 = vmul.f32 -1.442695, %v902_v29 }
 0x6ae   : > { %930 = vperm.xlu1 %2538, %v753_v27   ;;  %2552 = vpow2.f32 %v2100_v30  ;;  %v2305_v27 = vpop.f32.mrb[9].mxu0 }
 0x6b8   : > { %v2553_v31 = vpop.eup %2552 }
 0x6b9   : > { %v906_v32 = vadd.f32 1.0, %v2553_v31  ;;  %v1141_v31 = vld [vmem:[%s1140_s20] sm:$0x3]  ;;  %s1526_s20 = scalar_lea.vmem %s3283_s0, %s2113_s16 }
 0x6ba   : > { %v1322_v40 = vsub.f32 1.0, %v1141_v31 }
 0x6bb   : > { %2554 = vrcp.f32 %v906_v32  ;;  %v1212_v32 = vadd.f32 %v3004_v24, %v1211_v26 }
 0x6c5   : > { %v2555_v33 = vpop.eup %2554 }
 0x6c6   : > { %v920_v42 = vsub.f32 1.0, %v2555_v33  ;;  %v926_v44 = vmul.f32 %v2555_v33, %v747_v19 }
 0x71c   : > { %v911_v34 = vpop.permute.xlu1 %910 }
 0x71d   : > { %v913_v35 = vmul.f32 %v2555_v33, %v911_v34 }
 0x71f   : > { %915 = vrot.lane.b32.xlu0 %v913_v35, %s2728_s19 }
 0x723   : > { %937 = vperm.xlu0 %2539, %v934_v36  }
 0x72d   : > { %v931_v41 = vpop.permute.xlu1 %930 }
 0x791   : > { %v916_v37 = vpop.permute.xlu0 %915 }
 0x792   : > { %v918_v38 = vadd.f32 %v916_v37, %v824_v28 }
 0x794   : > { %2556 = vtanh.f32 %v918_v38 }
 0x79e   : > { %v2557_v39 = vpop.eup %2556 }
 0x79f   : > { %922 = vrot.lane.b32.xlu1 %v2557_v39, %s2729_s8 }
 0x7a2   : > { %v938_v46 = vpop.permute.xlu0 %937 }
 0x7a3   : > { %v940_v48 = vmul.f32 %v938_v46, %v747_v19 }
 0x811   : > { %v923_v43 = vpop.permute.xlu1 %922 }
 0x812   : > { %v925_v45 = vmul.f32 %v923_v43, %v920_v42 }
 0x814   : > { %v927_v47 = vadd.f32 %v926_v44, %v925_v45  ;;  %v1333_v44 = vld [vmem:[%s1332_s2] sm:$0x3]  ;;  %s2117_s2 = sshll.u32 %s1718_s28, 1  ;;  %s3239_s28 = scalar_lea.hbm %s3289_s6, %s2122_s14 }
 0x815   : > { %2326 = vmatmul.mubr.msk.f32.vlgmr.msra.gmra.mrb[10].mxu0 %vm361_vm1, %v1333_v44  ;;  %s1722_s13 = scalar_lea.vmem %s3284_s1, %s2117_s2 }
 0x816   : > { %v933_v49 = vmul.f32 %v931_v41, %v927_v47  ;;  %2457 = vmatpush3.bf16.msra.mxu0 %v2951_v5  ;;  %2347 = vmatprep.mubr.msk.f32.mxu0 %vm2725_vm0, %v2726_v1 }
 0x817   : > { %2458 = vmatprep.subr.bf16.mxu0 %v2724_v0 }
 0x818   : > { %v941_v50 = vadd.f32 %v940_v48, %v933_v49 }
 0x81a   : > { %1022 = vrot.lane.b32.xlu0 %v941_v50, %s2729_s8  ;;  %2460 = vmatpush3.bf16.msra.mxu0 %v2957_v12 }
 0x81b   : > { %2467 = vmatprep.subr.bf16.mxu0 %v2724_v0 }
 0x88c   : > { %v1023_v51 = vpop.permute.xlu0 %1022 }
 0x88d   : > { %2293 = vmatmul.mubr.msk.f32.vlgmr.msra.gmra.mrb[6].mxu1 %vm361_vm1, %v1023_v51 }
 0x88e   : > { %2439 = vmatpush3.bf16.msra.mxu1 %v2954_v9  ;;  %2314 = vmatprep.mubr.msk.f32.mxu1 %vm2725_vm0, %v2726_v1 }
 0x88f   : > { %2440 = vmatprep.subr.bf16.mxu1 %v2724_v0 }
 0x892   : > { %2442 = vmatpush3.bf16.msra.mxu1 %v2961_v13 }
 0x893   : > { %2449 = vmatprep.subr.bf16.mxu1 %v2724_v0 }
 0x960   : > { %v1092_v54 = vpop.f32.mrb[6].mxu1 }
 0x961   : > { %v1093_v55 = vadd.f32 %v2997_v18, %v1092_v54  ;;  %v2294_v56 = vpop.f32.mrb[7].mxu1 }
 0x962   : > { %v1405_v56 = vpop.f32.mrb[10].mxu0 }
 0x963   : > { %1104 = vrot.lane.b32.xlu1 %v1093_v55, %s2728_s19  ;;  %v1096_v59 = vadd.f32 %v1093_v55, %v1018_v58 }
 0x965   : > { %v2104_v60 = vmul.f32 -1.442695, %v1096_v59 }
 0x967   : > { %1124 = vperm.xlu1 %2538, %v947_v57   ;;  %2558 = vpow2.f32 %v2104_v60  ;;  %v2327_v57 = vpop.f32.mrb[11].mxu0 }
 0x971   : > { %v2559_v61 = vpop.eup %2558 }
 0x972   : > { %v1100_v62 = vadd.f32 1.0, %v2559_v61  ;;  %v1335_v61 = vld [vmem:[%s1334_s15] sm:$0x3]  ;;  %s1720_s15 = scalar_lea.vmem %s3283_s0, %s2117_s2  ;;  %s1919_s2 = scalar_lea.sflag [#allocation4], %s2928_s17 }
 0x973   : > { %v1516_v10 = vsub.f32 1.0, %v1335_v61 }
 0x974   : > { %2560 = vrcp.f32 %v1100_v62  ;;  %v1406_v62 = vadd.f32 %v3004_v24, %v1405_v56 }
 0x97e   : > { %v2561_v63 = vpop.eup %2560 }
 0x97f   : > { %v1114_v14 = vsub.f32 1.0, %v2561_v63  ;;  %v1120_v16 = vmul.f32 %v2561_v63, %v941_v50 }
 0x9d5   : > { %v1105_v2 = vpop.permute.xlu1 %1104 }
 0x9d6   : > { %v1107_v3 = vmul.f32 %v2561_v63, %v1105_v2 }
 0x9d8   : > { %1109 = vrot.lane.b32.xlu0 %v1107_v3, %s2728_s19 }
 0x9dc   : > { %1131 = vperm.xlu0 %2539, %v1128_v4  }
 0x9e6   : > { %v1125_v11 = vpop.permute.xlu1 %1124 }
 0xa4a   : > { %v1110_v6 = vpop.permute.xlu0 %1109 }
 0xa4b   : > { %v1112_v7 = vadd.f32 %v1110_v6, %v1018_v58 }
 0xa4d   : > { %2562 = vtanh.f32 %v1112_v7 }
 0xa57   : > { %v2563_v8 = vpop.eup %2562 }
 0xa58   : > { %1116 = vrot.lane.b32.xlu1 %v2563_v8, %s2729_s8 }
 0xa5b   : > { %v1132_v19 = vpop.permute.xlu0 %1131 }
 0xa5c   : > { %v1134_v21 = vmul.f32 %v1132_v19, %v941_v50 }
 0xaca   : > { %v1117_v15 = vpop.permute.xlu1 %1116 }
 0xacb   : > { %v1119_v17 = vmul.f32 %v1117_v15, %v1114_v14 }
 0xacd   : > { %v1121_v20 = vadd.f32 %v1120_v16, %v1119_v17  ;;  %v1527_v16 = vld [vmem:[%s1526_s20] sm:$0x3] }
 0xace   : > { %2348 = vmatmul.mubr.msk.f32.vlgmr.msra.gmra.mrb[12].mxu0 %vm361_vm1, %v1527_v16 }
 0xacf   : > { %v1127_v22 = vmul.f32 %v1125_v11, %v1121_v20  ;;  %2469 = vmatpush3.bf16.msra.mxu0 %v2951_v5  ;;  %2369 = vmatprep.mubr.msk.f32.mxu0 %vm2725_vm0, %v2726_v1 }
 0xad0   : > { %2470 = vmatprep.subr.bf16.mxu0 %v2724_v0 }
 0xad1   : > { %v1135_v23 = vadd.f32 %v1134_v21, %v1127_v22 }
 0xad3   : > { %1216 = vrot.lane.b32.xlu0 %v1135_v23, %s2729_s8  ;;  %2472 = vmatpush3.bf16.msra.mxu0 %v2957_v12 }
 0xb45   : > { %v1217_v25 = vpop.permute.xlu0 %1216 }
 0xb46   : > { %2315 = vmatmul.mubr.msk.f32.vlgmr.msra.gmra.mrb[8].mxu1 %vm361_vm1, %v1217_v25 }
 0xb47   : > { %2451 = vmatpush3.bf16.msra.mxu1 %v2954_v9  ;;  %2336 = vmatprep.mubr.msk.f32.mxu1 %vm2725_vm0, %v2726_v1 }
 0xb48   : > { %2452 = vmatprep.subr.bf16.mxu1 %v2724_v0 }
 0xb4b   : > { %2454 = vmatpush3.bf16.msra.mxu1 %v2961_v13 }
 0xb4c   : > { %2461 = vmatprep.subr.bf16.mxu1 %v2724_v0 }
 0xba1   : > { %v1599_v12 = vpop.f32.mrb[12].mxu0 }
 0xc19   : > { %v1286_v28 = vpop.f32.mrb[8].mxu1 }
 0xc1a   : > { %v1287_v29 = vadd.f32 %v2997_v18, %v1286_v28  ;;  %v2316_v30 = vpop.f32.mrb[9].mxu1 }
 0xc1c   : > { %1298 = vrot.lane.b32.xlu1 %v1287_v29, %s2728_s19  ;;  %v1290_v33 = vadd.f32 %v1287_v29, %v1212_v32  ;;  %v2349_v29 = vpop.f32.mrb[13].mxu0 }
 0xc1e   : > { %v2108_v34 = vmul.f32 -1.442695, %v1290_v33 }
 0xc20   : > { %1318 = vperm.xlu1 %2538, %v1141_v31   ;;  %2564 = vpow2.f32 %v2108_v34 }
 0xc2a   : > { %v2565_v35 = vpop.eup %2564 }
 0xc2b   : > { %v1294_v36 = vadd.f32 1.0, %v2565_v35 }
 0xc2d   : > { %2566 = vrcp.f32 %v1294_v36 }
 0xc37   : > { %v2567_v37 = vpop.eup %2566 }
 0xc38   : > { %v1308_v46 = vsub.f32 1.0, %v2567_v37  ;;  %v1314_v48 = vmul.f32 %v2567_v37, %v1135_v23 }
 0xc8e   : > { %v1299_v38 = vpop.permute.xlu1 %1298 }
 0xc8f   : > { %v1301_v39 = vmul.f32 %v2567_v37, %v1299_v38 }
 0xc91   : > { %1303 = vrot.lane.b32.xlu0 %v1301_v39, %s2728_s19 }
 0xc95   : > { %1325 = vperm.xlu0 %2539, %v1322_v40  }
 0xc9f   : > { %v1319_v45 = vpop.permute.xlu1 %1318 }
 0xd03   : > { %v1304_v41 = vpop.permute.xlu0 %1303 }
 0xd04   : > { %v1306_v42 = vadd.f32 %v1304_v41, %v1212_v32 }
 0xd06   : > { %2568 = vtanh.f32 %v1306_v42  ;;  %v1721_v42 = vld [vmem:[%s1720_s15] sm:$0x3] }
 0xd07   : > { %2370 = vmatmul.mubr.msk.f32.vlgmr.msra.gmra.mrb[14].mxu0 %vm361_vm1, %v1721_v42 }
 0xd10   : > { %v2569_v43 = vpop.eup %2568 }
 0xd11   : > { %1310 = vrot.lane.b32.xlu1 %v2569_v43, %s2729_s8 }
 0xd14   : > { %v1326_v50 = vpop.permute.xlu0 %1325 }
 0xd15   : > { %v1328_v52 = vmul.f32 %v1326_v50, %v1135_v23 }
 0xd83   : > { %v1311_v47 = vpop.permute.xlu1 %1310 }
 0xd84   : > { %v1313_v49 = vmul.f32 %v1311_v47, %v1308_v46 }
 0xd86   : > { %v1315_v51 = vadd.f32 %v1314_v48, %v1313_v49 }
 0xd88   : > { %v1321_v53 = vmul.f32 %v1319_v45, %v1315_v51 }
 0xd8a   : > { %v1329_v54 = vadd.f32 %v1328_v52, %v1321_v53 }
 0xd8c   : > { %1410 = vrot.lane.b32.xlu0 %v1329_v54, %s2729_s8 }
 0xdfe   : > { %v1411_v55 = vpop.permute.xlu0 %1410 }
 0xdff   : > { %2337 = vmatmul.mubr.msk.f32.vlgmr.msra.gmra.mrb[10].mxu1 %vm361_vm1, %v1411_v55 }
 0xe00   : > { %2463 = vmatpush3.bf16.msra.mxu1 %v2954_v9  ;;  %2358 = vmatprep.mubr.msk.f32.mxu1 %vm2725_vm0, %v2726_v1 }
 0xe01   : > { %2464 = vmatprep.subr.bf16.mxu1 %v2724_v0 }
 0xe04   : > { %2466 = vmatpush3.bf16.msra.mxu1 %v2961_v13 }
 0xe05   : > { %2473 = vmatprep.subr.bf16.mxu1 %v2724_v0 }
 0xed2   : > { %v1480_v58 = vpop.f32.mrb[10].mxu1 }
 0xed3   : > { %v1481_v59 = vadd.f32 %v2997_v18, %v1480_v58  ;;  %v2338_v60 = vpop.f32.mrb[11].mxu1 }
 0xed5   : > { %1492 = vrot.lane.b32.xlu1 %v1481_v59, %s2728_s19  ;;  %v1484_v63 = vadd.f32 %v1481_v59, %v1406_v62  ;;  %v1723_v59 = vld [vmem:[%s1722_s13] sm:$0x3] }
 0xed7   : > { %v2112_v2 = vmul.f32 -1.442695, %v1484_v63 }
 0xed9   : > { %1512 = vperm.xlu1 %2538, %v1335_v61   ;;  %2570 = vpow2.f32 %v2112_v2 }
 0xee3   : > { %v2571_v3 = vpop.eup %2570 }
 0xee4   : > { %v1488_v4 = vadd.f32 1.0, %v2571_v3 }
 0xee6   : > { %2572 = vrcp.f32 %v1488_v4 }
 0xef0   : > { %v2573_v6 = vpop.eup %2572 }
 0xef1   : > { %v1502_v19 = vsub.f32 1.0, %v2573_v6  ;;  %v1508_v21 = vmul.f32 %v2573_v6, %v1329_v54 }
 0xf47   : > { %v1493_v7 = vpop.permute.xlu1 %1492 }
 0xf48   : > { %v1495_v8 = vmul.f32 %v2573_v6, %v1493_v7  ;;  %v1904_v6 = vsub.f32 1.0, %v1723_v59 }
 0xf4a   : > { %1497 = vrot.lane.b32.xlu0 %v1495_v8, %s2728_s19 }
 0xf4e   : > { %1519 = vperm.xlu0 %2539, %v1516_v10  }
 0xf58   : > { %v1513_v17 = vpop.permute.xlu1 %1512 }
 0xfbc   : > { %v1498_v11 = vpop.permute.xlu0 %1497 }
 0xfbd   : > { %v1500_v14 = vadd.f32 %v1498_v11, %v1406_v62 }
 0xfbf   : > { %2574 = vtanh.f32 %v1500_v14 }
 0xfc9   : > { %v2575_v15 = vpop.eup %2574 }
 0xfca   : > { %1504 = vrot.lane.b32.xlu1 %v2575_v15, %s2729_s8 }
 0xfcd   : > { %v1520_v23 = vpop.permute.xlu0 %1519 }
 0xfce   : > { %v1522_v26 = vmul.f32 %v1520_v23, %v1329_v54  ;;  %v1793_v54 = vpop.f32.mrb[14].mxu0 }
 0xfcf   : > { %v2371_v55 = vpop.f32.mrb[15].mxu0  ;;  %v1794_v60 = vadd.f32 %v3004_v24, %v1793_v54 }
0x103c   : > { %v1505_v20 = vpop.permute.xlu1 %1504 }
0x103d   : > { %v1507_v22 = vmul.f32 %v1505_v20, %v1502_v19 }
0x103f   : > { %v1509_v25 = vadd.f32 %v1508_v21, %v1507_v22 }
0x1041   : > { %v1515_v27 = vmul.f32 %v1513_v17, %v1509_v25 }
0x1043   : > { %v1523_v28 = vadd.f32 %v1522_v26, %v1515_v27 }
0x1045   : > { %1604 = vrot.lane.b32.xlu0 %v1523_v28, %s2729_s8 }
0x10b7   : > { %v1605_v5 = vpop.permute.xlu0 %1604 }
0x10b8   : > { %2359 = vmatmul.mubr.msk.f32.vlgmr.msra.gmra.mrb[12].mxu1 %vm361_vm1, %v1605_v5 }
0x10b9   : > { %2475 = vmatpush3.bf16.msra.mxu1 %v2954_v9  ;;  %2380 = vmatprep.mubr.msk.f32.mxu1 %vm2725_vm0, %v2726_v1  ;;  %v1529_v9 = vld [vmem:[%s1528_s12] sm:$0x3]  ;;  %v1600_v1 = vadd.f32 %v3004_v24, %v1599_v12 }
0x10ba   : > { %2476 = vmatprep.subr.bf16.mxu1 %v2724_v0  ;;  %v1710_v38 = vsub.f32 1.0, %v1529_v9 }
0x10bd   : > { %2478 = vmatpush3.bf16.msra.mxu1 %v2961_v13 }
0x118b   : > { %v1674_v30 = vpop.f32.mrb[12].mxu1 }
0x118c   : > { %v1675_v31 = vadd.f32 %v2997_v18, %v1674_v30  ;;  %v2360_v32 = vpop.f32.mrb[13].mxu1 }
0x118e   : > { %1686 = vrot.lane.b32.xlu1 %v1675_v31, %s2728_s19  ;;  %v1678_v0 = vadd.f32 %v1675_v31, %v1600_v1 }
0x1190   : > { %v2116_v33 = vmul.f32 -1.442695, %v1678_v0 }
0x1192   : > { %1706 = vperm.xlu1 %2538, %v1529_v9   ;;  %2576 = vpow2.f32 %v2116_v33 }
0x119c   : > { %v2577_v13 = vpop.eup %2576 }
0x119d   : > { %v1682_v34 = vadd.f32 1.0, %v2577_v13 }
0x119f   : > { %2578 = vrcp.f32 %v1682_v34 }
0x11a9   : > { %v2579_v35 = vpop.eup %2578 }
0x11aa   : > { %v1696_v44 = vsub.f32 1.0, %v2579_v35  ;;  %v1702_v46 = vmul.f32 %v2579_v35, %v1523_v28 }
0x1200   : > { %v1687_v36 = vpop.permute.xlu1 %1686 }
0x1201   : > { %v1689_v37 = vmul.f32 %v2579_v35, %v1687_v36 }
0x1203   : > { %1691 = vrot.lane.b32.xlu0 %v1689_v37, %s2728_s19 }
0x1207   : > { %1713 = vperm.xlu0 %2539, %v1710_v38  }
0x1211   : > { %v1707_v43 = vpop.permute.xlu1 %1706 }
0x1275   : > { %v1692_v39 = vpop.permute.xlu0 %1691 }
0x1276   : > { %v1694_v40 = vadd.f32 %v1692_v39, %v1600_v1 }
0x1278   : > { %2580 = vtanh.f32 %v1694_v40 }
0x1282   : > { %v2581_v41 = vpop.eup %2580 }
0x1283   : > { %1698 = vrot.lane.b32.xlu1 %v2581_v41, %s2729_s8 }
0x1286   : > { %v1714_v48 = vpop.permute.xlu0 %1713 }
0x1287   : > { %v1716_v50 = vmul.f32 %v1714_v48, %v1523_v28 }
0x12f5   : > { %v1699_v45 = vpop.permute.xlu1 %1698 }
0x12f6   : > { %v1701_v47 = vmul.f32 %v1699_v45, %v1696_v44 }
0x12f8   : > { %v1703_v49 = vadd.f32 %v1702_v46, %v1701_v47 }
0x12fa   : > { %v1709_v51 = vmul.f32 %v1707_v43, %v1703_v49 }
0x12fc   : > { %v1717_v52 = vadd.f32 %v1716_v50, %v1709_v51 }
0x12fe   : > { %1798 = vrot.lane.b32.xlu0 %v1717_v52, %s2729_s8 }
0x1370   : > { %v1799_v53 = vpop.permute.xlu0 %1798 }
0x1371   : > { %2381 = vmatmul.mubr.msk.f32.vlgmr.msra.gmra.mrb[14].mxu1 %vm361_vm1, %v1799_v53 }
0x1444   : > { %v1868_v56 = vpop.f32.mrb[14].mxu1 }
0x1445   : > { %v1869_v57 = vadd.f32 %v2997_v18, %v1868_v56  ;;  %v2382_v58 = vpop.f32.mrb[15].mxu1 }
0x1447   : > { %1880 = vrot.lane.b32.xlu1 %v1869_v57, %s2728_s19  ;;  %v1872_v61 = vadd.f32 %v1869_v57, %v1794_v60 }
0x1449   : > { %v2120_v62 = vmul.f32 -1.442695, %v1872_v61 }
0x144b   : > { %1900 = vperm.xlu1 %2538, %v1723_v59   ;;  %2582 = vpow2.f32 %v2120_v62 }
0x1455   : > { %v2583_v63 = vpop.eup %2582 }
0x1456   : > { %v1876_v2 = vadd.f32 1.0, %v2583_v63 }
0x1458   : > { %2584 = vrcp.f32 %v1876_v2 }
0x1462   : > { %v2585_v3 = vpop.eup %2584 }
0x1463   : > { %v1890_v11 = vsub.f32 1.0, %v2585_v3  ;;  %v1896_v15 = vmul.f32 %v2585_v3, %v1717_v52 }
0x14b9   : > { %v1881_v4 = vpop.permute.xlu1 %1880 }
0x14ba   : > { %v1883_v18 = vmul.f32 %v2585_v3, %v1881_v4 }
0x14bc   : > { %1885 = vrot.lane.b32.xlu0 %v1883_v18, %s2728_s19  ;;  %s2087_s19 = sshll.u32 %s2928_s17, 1 }
0x14bd   : > { %s331_s20 = scalar_lea.vmem [#allocation7], %s2087_s19 }
0x14be   : > { %s1932_s26 = sshll.u32 %s331_s20, 4  ;;  %s3241_s26 = int_to_ptr.vmem [resolvable:$true] %s1932_s26 }
0x14bf   : > { %s2648_s11 = scalar_lea.vmem %s3241_s26, 32 }
0x14c0   : > { %1907 = vperm.xlu0 %2539, %v1904_v6   ;;  %p2649_p3 = scmp.ne.s32.totalorder %s3241_s26, %s2648_s11 }
0x14c2   : > { %p2650_p2 = pnand %p2649_p3, %p3312_p0 }
0x14c4   : > { %p2651_p5 = pneg %p2650_p2 }
0x14ca   : > { %v1901_v24 = vpop.permute.xlu1 %1900 }
0x152e   : > { %v1886_v7 = vpop.permute.xlu0 %1885 }
0x152f   : > { %v1888_v8 = vadd.f32 %v1886_v7, %v1794_v60 }
0x1531   : > { %2586 = vtanh.f32 %v1888_v8 }
0x153b   : > { %v2587_v10 = vpop.eup %2586 }
0x153c   : > { %1892 = vrot.lane.b32.xlu1 %v2587_v10, %s2729_s8 }
0x153f   : > { %v1908_v17 = vpop.permute.xlu0 %1907 }
0x1540   : > { %v1910_v20 = vmul.f32 %v1908_v17, %v1717_v52 }
0x15ae   : > { %v1893_v14 = vpop.permute.xlu1 %1892 }
0x15af   : > { %v1895_v16 = vmul.f32 %v1893_v14, %v1890_v11 }
0x15b1   : > { %v1897_v19 = vadd.f32 %v1896_v15, %v1895_v16 }
0x15b3   : > { %v1903_v21 = vmul.f32 %v1901_v24, %v1897_v19 }
0x15b5   : > { %v1911_v22 = vadd.f32 %v1910_v20, %v1903_v21 }
0x15b7   : > { %1913 = vrot.lane.b32.xlu0 %v1911_v22, %s2729_s8  ;;  %s2652_s8 = sshll.u32 %s2730_s25, 4  ;;  %s2653_s8 = int_to_ptr.vmem [resolvable:$false] %s2652_s8 }
0x15b8   : > { %s2654_s7 = scalar_lea.vmem %s2653_s8, 64  ;;  %p2655_p6 = scmp.lt.s32.totalorder %s3241_s26, %s2653_s8 }
0x15b9   : > { %p2656_p13 = scmp.lt.s32.totalorder %s2654_s7, %s2648_s11 }
0x15bb   : > { %p2657_p1 = por %p2656_p13, %p2655_p6 }
0x15bd   : > { %p2658_p11 = pnand %p2657_p1, %p2651_p5 }
0x1629   : > { %v1914_v23 = vpop.permute.xlu0 %1913 }
0x162a   : > { %1917 = vst.msk [vmem:[%s331_s20] sm:$0x3] %vm1916_vm2, %v1914_v23 }
0x162b   : > { %2661 = shalt.err (!%p2658_p11)
}
0x162c   : > { %s2662_s17 = scalar_lea.hbm %s3239_s28, 32  ;;  %s2666_s16 = scalar_lea.hbm %s3289_s6, 64 }
0x162d   : > { %p2663_p10 = scmp.ne.s32.totalorder %s3239_s28, %s2662_s17  ;;  %p2667_p4 = scmp.lt.u32.totalorder %s3239_s28, %s3289_s6 }
0x162e   : > { %p2668_p9 = scmp.lt.u32.totalorder %s2666_s16, %s2662_s17  ;;  %p2670_p3 = scmp.lt.u32.totalorder %s2662_s17, %s3239_s28 }
0x162f   : > { %p2664_p7 = pnand %p2663_p10, %p3312_p0 }
0x1630   : > { %p2669_p12 = por %p2668_p9, %p2667_p4 }
0x1631   : > { %p2665_p8 = pneg %p2664_p7 }
0x1632   : > { %p2671_p2 = por %p2670_p3, %p2669_p12 }
0x1634   : > { %p2672_p5 = pnand %p2671_p2, %p2665_p8 }
0x1636   : > { %2675 = shalt.err (!%p2672_p5)
}
0x1637   : > { %2483 = dma.vmem_to_hbm [thread:$0]  (%p3312_p0), %s3241_s26, 32, %s3239_s28, %s1919_s2  }
0x1638 PF: > { %s1944_s14 = sand.u32 1, %s2706_s21   ;;  %p3313_p6 = scmp.ne.s32.totalorder %s3298_s10, 0 }
0x1639   : > { %p3314_p13 = scmp.ge.s32.totalorder %s2718_s24, 2  ;;  %s1945_s20 = scalar_lea.sflag [#allocation4], %s1944_s14 }
0x163b   : > { %p2493_p1 = pnand %p3314_p13, %p3313_p6 }
0x163d   : > { %2701 = dma.done.wait (!%p2493_p1), %s1945_s20, 32  }
0x163e   : > { %2703 = vsyncadd (!%p2493_p1), %s1945_s20, 4294967264  ;;  %p22_p11 = scmp.ge.s32.totalorder %s2791_s27, 4   ;;  %s3315_s21 = smov %s2710_s22 }
0x163f   : > { %s3316_s22 = smov %s2714_s23  ;;  %s3317_s23 = smov %s2803_s30 }
0x1640   : > { %s3318_s24 = smov %s2791_s27  ;;  %24 = sbr.rel (!%p22_p11) target bundleno = 9 (0x9), region = 124 }
0x1647   :  { %1950 = vsyncpa [#allocation3], 1 }
0x1648   :  { %1952 = vsyncpa [#allocation3 + $0x1], 1 }
0x1649   :  { %1953 = vsyncpa [#allocation6], 1 }
0x164a   :  { %1955 = vsyncpa [#allocation6 + $0x1], 1 }
0x164b   :  { %1956 = vsyncpa [#allocation4], 1 }
0x164c   :  { %1958 = vsyncpa [#allocation4 + $0x1], 1 }

</bundles_post_ra>
